<compile_context>
chip_gen: v5e
topology: v5e:2x2
jax: 0.10.0
libtpu: 0.0.40
codegen_flags: <defaults>
</compile_context>

<pallas_src>
import jax
import jax.numpy as jnp
from jax.experimental import pallas as pl
from jax.experimental.pallas import tpu as pltpu

_LANE = 128
_SUBLANE = 8
# Per-block payload cap (input block; output block is the same size). With
# double buffering of both sides this is ~4x this figure of VMEM usage ->
# comfortably under the scoped default on every generation incl. v7x.
_BLOCK_BYTES = 2 << 20  # 2 MiB


def _copy_kernel(x_ref, o_ref):
    # Pure element-for-element copy of the current lane-dense tile.
    o_ref[...] = x_ref[...]


def _pick_width(total):
    """Largest lane-dense width (multiple of 128) dividing `total`, preferring
    widths whose resulting row count is a multiple of the sublane tile."""
    widths = (8192, 4096, 2048, 1024, 512, 256, 128)
    for w in widths:
        if total % w == 0 and (total // w) % _SUBLANE == 0:
            return w
    for w in widths:
        if total % w == 0:
            return w
    return None


def _pick_row_tile(rows, width, itemsize):
    """Largest multiple-of-8 divisor of `rows` whose block fits the budget."""
    max_rows = max(_SUBLANE, _BLOCK_BYTES // (width * itemsize))
    best = _SUBLANE
    for cand in range(_SUBLANE, min(rows, max_rows) + 1, _SUBLANE):
        if rows % cand == 0:
            best = cand
    return best


def shape_forward(x, out_dim=10):
    """Equivalent of Shape.forward: x.view(-1, 1, out_dim)."""
    total = x.size
    assert total % out_dim == 0, "total elements must be divisible by out_dim"
    out_rows = total // out_dim
    itemsize = jnp.dtype(x.dtype).itemsize

    w = _pick_width(total)
    if w is None:
        # Tiny / oddly-sized inputs: single full-array block (exempt from the
        # (8, 128) divisibility rule because block_shape == array shape).
        x2 = jnp.reshape(x, (out_rows, out_dim))
        out = pl.pallas_call(
            _copy_kernel,
            out_shape=jax.ShapeDtypeStruct((out_rows, out_dim), x.dtype),
            grid=(1,),
            in_specs=[pl.BlockSpec((out_rows, out_dim), lambda i: (0, 0))],
            out_specs=pl.BlockSpec((out_rows, out_dim), lambda i: (0, 0)),
            input_output_aliases={0: 0},
        )(x2)
        return jnp.reshape(out, (out_rows, 1, out_dim))

    # Lane-dense, row-tiled path.
    rows = total // w
    if rows % _SUBLANE == 0:
        tile_rows = _pick_row_tile(rows, w, itemsize)
    else:
        # Full-row block: exempt from sublane divisibility (block dim == array dim).
        tile_rows = rows
    grid = (rows // tile_rows,)

    x2 = jnp.reshape(x, (rows, w))
    out = pl.pallas_call(
        _copy_kernel,
        out_shape=jax.ShapeDtypeStruct((rows, w), x.dtype),
        grid=grid,
        in_specs=[pl.BlockSpec((tile_rows, w), lambda i: (i, 0))],
        out_specs=pl.BlockSpec((tile_rows, w), lambda i: (i, 0)),
        input_output_aliases={0: 0},
        compiler_params=pltpu.CompilerParams(
            dimension_semantics=("parallel",)),
    )(x2)
    return jnp.reshape(out, (out_rows, 1, out_dim))


if __name__ == "__main__":
    key = jax.random.PRNGKey(0)
    out_dim = 10
    fwd = jax.jit(shape_forward, static_argnames=("out_dim",))

    # 1) Lane-dense, row-tiled parallel grid (grid > 1):
    #    total = 16*4*64*160 = 655360 -> (R, W) = (80, 8192), tile (40, 8192).
    x_a = jax.random.normal(key, (16, 4, 64, 160), dtype=jnp.float32)
    # 2) Lane-dense, single block: total = 8*4*32*40 = 40960 -> (40, 1024).
    x_b = jax.random.normal(key, (8, 4, 32, 40), dtype=jnp.float32)
    # 3) Tiny fallback path (no 128-multiple factor): total = 80 elements.
    x_c = jax.random.normal(key, (2, 4, 10), dtype=jnp.float32)

    ok = True
    for x in (x_a, x_b, x_c):
        y = jax.block_until_ready(fwd(x, out_dim=out_dim))
        ref = jnp.reshape(x, (-1, 1, out_dim))
        ok &= (y.shape == ref.shape) and (y.dtype == x.dtype)
        ok &= bool(jnp.array_equal(y, ref))
    assert ok
    print("KERNEL_OK")
</pallas_src>

<mosaic_0001>
module attributes {stable_mosaic.version = 11 : i64} {
  func.func @_copy_kernel(%arg0: i32, %arg1: memref<40x8192xf32, #tpu.memory_space<vmem>>, %arg2: memref<40x8192xf32, #tpu.memory_space<vmem>>) attributes {dimension_semantics = [#tpu.dimension_semantics<parallel>], iteration_bounds = array<i64: 2>, scalar_prefetch = 0 : i64, scratch_operands = 0 : i64, tpu.core_type = #tpu.core_type<tc>, window_params = [{transform_indices = @transform_0, window_bounds = array<i64: 40, 8192>}, {transform_indices = @transform_1, window_bounds = array<i64: 40, 8192>}]} {
    %c0 = arith.constant 0 : index
    %c0_0 = arith.constant 0 : index
    %0 = vector.load %arg1[%c0, %c0_0] : memref<40x8192xf32, #tpu.memory_space<vmem>>, vector<40x8192xf32>
    %c0_1 = arith.constant 0 : index
    %c0_2 = arith.constant 0 : index
    %1 = vector.load %arg2[%c0_1, %c0_2] : memref<40x8192xf32, #tpu.memory_space<vmem>>, vector<40x8192xf32>
    tpu.vector_store %arg2[%c0_1, %c0_2], %0 {strides = array<i32>} : memref<40x8192xf32, #tpu.memory_space<vmem>>, vector<40x8192xf32>,
    return
  }
  func.func @transform_0(%arg0: i32) -> (i32, i32) {
    %c0_i32 = arith.constant 0 : i32
    %c0_i32_0 = arith.constant 0 : i32
    return %arg0, %c0_i32 : i32, i32
  }
  func.func @transform_1(%arg0: i32) -> (i32, i32) {
    %c0_i32 = arith.constant 0 : i32
    %c0_i32_0 = arith.constant 0 : i32
    return %arg0, %c0_i32 : i32, i32
  }
}

</mosaic_0001>

<bundles_post_ra>
// kernel: shape_forward.1
= control target key start
LH: loop header
LB: loop body
LE: loop exit
PB: predicated region body
PF: predicated region fallthrough
CT: control target
= control target key end

     0   :  { %s862_s6 = smov 0   ;;  %s2490_s0 = inlined_call_operand.vmem [shape: f32[80,8192], index: 0, kind: input, shape index: {}, may-alias: {0,1}]   ;;  %s2491_s1 = inlined_call_operand.vmem [shape: f32[80,8192], index: 1, kind: output, shape index: {}, may-alias: {0,1}]  }
   0x1 LB: > { %s823_s7 = sadd.s32 4294967295, %s850_s6   ;;  %p827_p0 = scmp.ge.s32.totalorder %s850_s6, 1  ;;  %s850_s6 = sphi %s862_s6, %s11_s6  }
   0x2   : > { %p89_p1 = scmp.lt.s32.totalorder %s850_s6, 3 }
   0x4   : > { %p90_p2 = pnand %p827_p0, %p89_p1 }
   0x6   : > { %93 = sbr.rel (%p90_p2) target bundleno = 613 (0x265), region = 24 }
   0xb   : > { %s111_s8 = smul.u32 5, %s823_s7 }
   0xd   : > { %p112_p3 = scmp.lt.s32.totalorder %s111_s8, 9 }
   0xf   : > { %s3005_s8 = smov (!%p112_p3, %s111_s8), 9 }
  0x10   : > { %s834_s9 = sshll.u32 %s3005_s8, 9 }
  0x11   : > { %s878_s12 = scalar_lea.vmem %s2490_s0, %s834_s9  ;;  %s1821_s15 = scalar_lea.vmem %s2491_s1, %s834_s9 }
  0x12   : > { %v881_v0 = vld [vmem:[%s878_s12] sm:$0xff]  ;;  %v884_v1 = vld [vmem:[%s878_s12 + $0x8] sm:$0xff]  ;;  %v887_v2 = vld [vmem:[%s878_s12 + $0x10] sm:$0xff] }
  0x13   : > { %v890_v3 = vld [vmem:[%s878_s12 + $0x18] sm:$0xff]  ;;  %v893_v4 = vld [vmem:[%s878_s12 + $0x20] sm:$0xff]  ;;  %v896_v5 = vld [vmem:[%s878_s12 + $0x28] sm:$0xff] }
  0x14   : > { %v899_v6 = vld [vmem:[%s878_s12 + $0x30] sm:$0xff]  ;;  %v902_v7 = vld [vmem:[%s878_s12 + $0x38] sm:$0xff]  ;;  %v905_v8 = vld [vmem:[%s878_s12 + $0x40] sm:$0xff] }
  0x15   : > { %v908_v9 = vld [vmem:[%s878_s12 + $0x48] sm:$0xff]  ;;  %v911_v10 = vld [vmem:[%s878_s12 + $0x50] sm:$0xff]  ;;  %v914_v11 = vld [vmem:[%s878_s12 + $0x58] sm:$0xff] }
  0x16   : > { %v917_v12 = vld [vmem:[%s878_s12 + $0x60] sm:$0xff]  ;;  %v920_v13 = vld [vmem:[%s878_s12 + $0x68] sm:$0xff]  ;;  %v923_v14 = vld [vmem:[%s878_s12 + $0x70] sm:$0xff] }
  0x17   : > { %v926_v15 = vld [vmem:[%s878_s12 + $0x78] sm:$0xff]  ;;  %v929_v16 = vld [vmem:[%s878_s12 + $0x80] sm:$0xff]  ;;  %v932_v17 = vld [vmem:[%s878_s12 + $0x88] sm:$0xff] }
  0x18   : > { %v935_v18 = vld [vmem:[%s878_s12 + $0x90] sm:$0xff]  ;;  %v938_v19 = vld [vmem:[%s878_s12 + $0x98] sm:$0xff]  ;;  %v941_v20 = vld [vmem:[%s878_s12 + $0xa0] sm:$0xff] }
  0x19   : > { %v944_v21 = vld [vmem:[%s878_s12 + $0xa8] sm:$0xff]  ;;  %v947_v22 = vld [vmem:[%s878_s12 + $0xb0] sm:$0xff]  ;;  %v950_v23 = vld [vmem:[%s878_s12 + $0xb8] sm:$0xff] }
  0x1a   : > { %v953_v24 = vld [vmem:[%s878_s12 + $0xc0] sm:$0xff]  ;;  %v956_v25 = vld [vmem:[%s878_s12 + $0xc8] sm:$0xff]  ;;  %v959_v26 = vld [vmem:[%s878_s12 + $0xd0] sm:$0xff] }
  0x1b   : > { %v962_v27 = vld [vmem:[%s878_s12 + $0xd8] sm:$0xff]  ;;  %v965_v28 = vld [vmem:[%s878_s12 + $0xe0] sm:$0xff]  ;;  %v968_v29 = vld [vmem:[%s878_s12 + $0xe8] sm:$0xff] }
  0x1c   : > { %v971_v30 = vld [vmem:[%s878_s12 + $0xf0] sm:$0xff]  ;;  %v974_v31 = vld [vmem:[%s878_s12 + $0xf8] sm:$0xff]  ;;  %v977_v32 = vld [vmem:[%s878_s12 + $0x100] sm:$0xff] }
  0x1d   : > { %v980_v33 = vld [vmem:[%s878_s12 + $0x108] sm:$0xff]  ;;  %v983_v34 = vld [vmem:[%s878_s12 + $0x110] sm:$0xff]  ;;  %v986_v35 = vld [vmem:[%s878_s12 + $0x118] sm:$0xff] }
  0x1e   : > { %v989_v36 = vld [vmem:[%s878_s12 + $0x120] sm:$0xff]  ;;  %v992_v37 = vld [vmem:[%s878_s12 + $0x128] sm:$0xff]  ;;  %v995_v38 = vld [vmem:[%s878_s12 + $0x130] sm:$0xff] }
  0x1f   : > { %v998_v39 = vld [vmem:[%s878_s12 + $0x138] sm:$0xff]  ;;  %v1001_v40 = vld [vmem:[%s878_s12 + $0x140] sm:$0xff]  ;;  %v1004_v41 = vld [vmem:[%s878_s12 + $0x148] sm:$0xff] }
  0x20   : > { %v1007_v42 = vld [vmem:[%s878_s12 + $0x150] sm:$0xff]  ;;  %v1010_v43 = vld [vmem:[%s878_s12 + $0x158] sm:$0xff]  ;;  %v1013_v44 = vld [vmem:[%s878_s12 + $0x160] sm:$0xff] }
  0x21   : > { %v1016_v45 = vld [vmem:[%s878_s12 + $0x168] sm:$0xff]  ;;  %v1019_v46 = vld [vmem:[%s878_s12 + $0x170] sm:$0xff]  ;;  %v1022_v47 = vld [vmem:[%s878_s12 + $0x178] sm:$0xff] }
  0x22   : > { %v1025_v48 = vld [vmem:[%s878_s12 + $0x180] sm:$0xff]  ;;  %v1028_v49 = vld [vmem:[%s878_s12 + $0x188] sm:$0xff]  ;;  %v1031_v50 = vld [vmem:[%s878_s12 + $0x190] sm:$0xff] }
  0x23   : > { %v1034_v51 = vld [vmem:[%s878_s12 + $0x198] sm:$0xff]  ;;  %v1037_v52 = vld [vmem:[%s878_s12 + $0x1a0] sm:$0xff]  ;;  %v1040_v53 = vld [vmem:[%s878_s12 + $0x1a8] sm:$0xff] }
  0x24   : > { %v1043_v54 = vld [vmem:[%s878_s12 + $0x1b0] sm:$0xff]  ;;  %v1046_v55 = vld [vmem:[%s878_s12 + $0x1b8] sm:$0xff]  ;;  %v1049_v56 = vld [vmem:[%s878_s12 + $0x1c0] sm:$0xff] }
  0x25   : > { %2492 = vst [vmem:[#allocation2_spill] sm:$0xff] %v1046_v55  ;;  %v1052_v57 = vld [vmem:[%s878_s12 + $0x1c8] sm:$0xff]  ;;  %v1055_v58 = vld [vmem:[%s878_s12 + $0x1d0] sm:$0xff]  ;;  %v1058_v59 = vld [vmem:[%s878_s12 + $0x1d8] sm:$0xff] }
  0x26   : > { %2493 = vst [vmem:[#allocation3_spill] sm:$0xff] %v1049_v56  ;;  %v1061_v60 = vld [vmem:[%s878_s12 + $0x1e0] sm:$0xff]  ;;  %v1064_v61 = vld [vmem:[%s878_s12 + $0x1e8] sm:$0xff]  ;;  %v1067_v62 = vld [vmem:[%s878_s12 + $0x1f0] sm:$0xff] }
  0x27   : > { %2494 = vst [vmem:[#allocation4_spill] sm:$0xff] %v1052_v57  ;;  %v1070_v63 = vld [vmem:[%s878_s12 + $0x1f8] sm:$0xff]  ;;  %v1073_v57 = vld [vmem:[%s878_s12 + $0x200] sm:$0xff]  ;;  %v1799_v56 = vld [vmem:[%s878_s12 + $0x990] sm:$0xff] }
  0x28   : > { %2495 = vst [vmem:[#allocation5_spill] sm:$0xff] %v1055_v58  ;;  %v1076_v58 = vld [vmem:[%s878_s12 + $0x208] sm:$0xff] }
  0x29   : > { %2496 = vst [vmem:[#allocation6_spill] sm:$0xff] %v1058_v59  ;;  %v1079_v59 = vld [vmem:[%s878_s12 + $0x210] sm:$0xff]  ;;  %v1808_v55 = vld [vmem:[%s878_s12 + $0x9a8] sm:$0xff] }
  0x2a   : > { %2497 = vst [vmem:[#allocation7_spill] sm:$0xff] %v1061_v60  ;;  %v1082_v60 = vld [vmem:[%s878_s12 + $0x218] sm:$0xff] }
  0x2b   : > { %2498 = vst [vmem:[#allocation8_spill] sm:$0xff] %v1064_v61  ;;  %v1085_v61 = vld [vmem:[%s878_s12 + $0x220] sm:$0xff] }
  0x2c   : > { %2499 = vst [vmem:[#allocation9_spill] sm:$0xff] %v1067_v62  ;;  %v1088_v62 = vld [vmem:[%s878_s12 + $0x228] sm:$0xff] }
  0x2d   : > { %2500 = vst [vmem:[#allocation10_spill] sm:$0xff] %v1070_v63  ;;  %v1091_v63 = vld [vmem:[%s878_s12 + $0x230] sm:$0xff] }
  0x2e   : > { %2501 = vst [vmem:[#allocation11_spill] sm:$0xff] %v1073_v57  ;;  %v1094_v57 = vld [vmem:[%s878_s12 + $0x238] sm:$0xff] }
  0x2f   : > { %2502 = vst [vmem:[#allocation12_spill] sm:$0xff] %v1076_v58  ;;  %v1097_v58 = vld [vmem:[%s878_s12 + $0x240] sm:$0xff] }
  0x30   : > { %2503 = vst [vmem:[#allocation13_spill] sm:$0xff] %v1079_v59  ;;  %v1100_v59 = vld [vmem:[%s878_s12 + $0x248] sm:$0xff] }
  0x31   : > { %2504 = vst [vmem:[#allocation14_spill] sm:$0xff] %v1082_v60  ;;  %v1103_v60 = vld [vmem:[%s878_s12 + $0x250] sm:$0xff] }
  0x32   : > { %2505 = vst [vmem:[#allocation15_spill] sm:$0xff] %v1085_v61  ;;  %v1106_v61 = vld [vmem:[%s878_s12 + $0x258] sm:$0xff] }
  0x33   : > { %2506 = vst [vmem:[#allocation16_spill] sm:$0xff] %v1088_v62  ;;  %v1109_v62 = vld [vmem:[%s878_s12 + $0x260] sm:$0xff] }
  0x34   : > { %2507 = vst [vmem:[#allocation17_spill] sm:$0xff] %v1091_v63  ;;  %v1112_v63 = vld [vmem:[%s878_s12 + $0x268] sm:$0xff] }
  0x35   : > { %2508 = vst [vmem:[#allocation18_spill] sm:$0xff] %v1094_v57  ;;  %v1115_v57 = vld [vmem:[%s878_s12 + $0x270] sm:$0xff] }
  0x36   : > { %2509 = vst [vmem:[#allocation19_spill] sm:$0xff] %v1097_v58  ;;  %v1118_v58 = vld [vmem:[%s878_s12 + $0x278] sm:$0xff] }
  0x37   : > { %2510 = vst [vmem:[#allocation20_spill] sm:$0xff] %v1100_v59  ;;  %v1121_v59 = vld [vmem:[%s878_s12 + $0x280] sm:$0xff] }
  0x38   : > { %2511 = vst [vmem:[#allocation21_spill] sm:$0xff] %v1103_v60  ;;  %v1124_v60 = vld [vmem:[%s878_s12 + $0x288] sm:$0xff] }
  0x39   : > { %2512 = vst [vmem:[#allocation22_spill] sm:$0xff] %v1106_v61  ;;  %v1127_v61 = vld [vmem:[%s878_s12 + $0x290] sm:$0xff] }
  0x3a   : > { %2513 = vst [vmem:[#allocation23_spill] sm:$0xff] %v1109_v62  ;;  %v1130_v62 = vld [vmem:[%s878_s12 + $0x298] sm:$0xff] }
  0x3b   : > { %2514 = vst [vmem:[#allocation24_spill] sm:$0xff] %v1112_v63  ;;  %v1133_v63 = vld [vmem:[%s878_s12 + $0x2a0] sm:$0xff] }
  0x3c   : > { %2515 = vst [vmem:[#allocation25_spill] sm:$0xff] %v1115_v57  ;;  %v1136_v57 = vld [vmem:[%s878_s12 + $0x2a8] sm:$0xff] }
  0x3d   : > { %2516 = vst [vmem:[#allocation26_spill] sm:$0xff] %v1118_v58  ;;  %v1139_v58 = vld [vmem:[%s878_s12 + $0x2b0] sm:$0xff] }
  0x3e   : > { %2517 = vst [vmem:[#allocation27_spill] sm:$0xff] %v1121_v59  ;;  %v1142_v59 = vld [vmem:[%s878_s12 + $0x2b8] sm:$0xff] }
  0x3f   : > { %2518 = vst [vmem:[#allocation28_spill] sm:$0xff] %v1124_v60  ;;  %v1145_v60 = vld [vmem:[%s878_s12 + $0x2c0] sm:$0xff] }
  0x40   : > { %2519 = vst [vmem:[#allocation29_spill] sm:$0xff] %v1127_v61  ;;  %v1148_v61 = vld [vmem:[%s878_s12 + $0x2c8] sm:$0xff] }
  0x41   : > { %2520 = vst [vmem:[#allocation30_spill] sm:$0xff] %v1130_v62  ;;  %v1151_v62 = vld [vmem:[%s878_s12 + $0x2d0] sm:$0xff] }
  0x42   : > { %2521 = vst [vmem:[#allocation31_spill] sm:$0xff] %v1133_v63  ;;  %v1154_v63 = vld [vmem:[%s878_s12 + $0x2d8] sm:$0xff] }
  0x43   : > { %2522 = vst [vmem:[#allocation32_spill] sm:$0xff] %v1136_v57  ;;  %v1157_v57 = vld [vmem:[%s878_s12 + $0x2e0] sm:$0xff] }
  0x44   : > { %2523 = vst [vmem:[#allocation33_spill] sm:$0xff] %v1139_v58  ;;  %v1160_v58 = vld [vmem:[%s878_s12 + $0x2e8] sm:$0xff] }
  0x45   : > { %2524 = vst [vmem:[#allocation34_spill] sm:$0xff] %v1142_v59  ;;  %v1163_v59 = vld [vmem:[%s878_s12 + $0x2f0] sm:$0xff] }
  0x46   : > { %2525 = vst [vmem:[#allocation35_spill] sm:$0xff] %v1145_v60  ;;  %v1166_v60 = vld [vmem:[%s878_s12 + $0x2f8] sm:$0xff] }
  0x47   : > { %2526 = vst [vmem:[#allocation36_spill] sm:$0xff] %v1148_v61  ;;  %v1169_v61 = vld [vmem:[%s878_s12 + $0x300] sm:$0xff] }
  0x48   : > { %2527 = vst [vmem:[#allocation37_spill] sm:$0xff] %v1151_v62  ;;  %v1172_v62 = vld [vmem:[%s878_s12 + $0x308] sm:$0xff] }
  0x49   : > { %2528 = vst [vmem:[#allocation38_spill] sm:$0xff] %v1154_v63  ;;  %v1175_v63 = vld [vmem:[%s878_s12 + $0x310] sm:$0xff] }
  0x4a   : > { %2529 = vst [vmem:[#allocation39_spill] sm:$0xff] %v1157_v57  ;;  %v1178_v57 = vld [vmem:[%s878_s12 + $0x318] sm:$0xff] }
  0x4b   : > { %2530 = vst [vmem:[#allocation40_spill] sm:$0xff] %v1160_v58  ;;  %v1181_v58 = vld [vmem:[%s878_s12 + $0x320] sm:$0xff] }
  0x4c   : > { %2531 = vst [vmem:[#allocation41_spill] sm:$0xff] %v1163_v59  ;;  %v1184_v59 = vld [vmem:[%s878_s12 + $0x328] sm:$0xff] }
  0x4d   : > { %2532 = vst [vmem:[#allocation42_spill] sm:$0xff] %v1166_v60  ;;  %v1187_v60 = vld [vmem:[%s878_s12 + $0x330] sm:$0xff] }
  0x4e   : > { %2533 = vst [vmem:[#allocation43_spill] sm:$0xff] %v1169_v61  ;;  %v1190_v61 = vld [vmem:[%s878_s12 + $0x338] sm:$0xff] }
  0x4f   : > { %2534 = vst [vmem:[#allocation44_spill] sm:$0xff] %v1172_v62  ;;  %v1193_v62 = vld [vmem:[%s878_s12 + $0x340] sm:$0xff] }
  0x50   : > { %2535 = vst [vmem:[#allocation45_spill] sm:$0xff] %v1175_v63  ;;  %v1196_v63 = vld [vmem:[%s878_s12 + $0x348] sm:$0xff] }
  0x51   : > { %2536 = vst [vmem:[#allocation46_spill] sm:$0xff] %v1178_v57  ;;  %v1199_v57 = vld [vmem:[%s878_s12 + $0x350] sm:$0xff] }
  0x52   : > { %2537 = vst [vmem:[#allocation47_spill] sm:$0xff] %v1181_v58  ;;  %v1202_v58 = vld [vmem:[%s878_s12 + $0x358] sm:$0xff] }
  0x53   : > { %2538 = vst [vmem:[#allocation48_spill] sm:$0xff] %v1184_v59  ;;  %v1205_v59 = vld [vmem:[%s878_s12 + $0x360] sm:$0xff] }
  0x54   : > { %2539 = vst [vmem:[#allocation49_spill] sm:$0xff] %v1187_v60  ;;  %v1208_v60 = vld [vmem:[%s878_s12 + $0x368] sm:$0xff] }
  0x55   : > { %2540 = vst [vmem:[#allocation50_spill] sm:$0xff] %v1190_v61  ;;  %v1211_v61 = vld [vmem:[%s878_s12 + $0x370] sm:$0xff] }
  0x56   : > { %2541 = vst [vmem:[#allocation51_spill] sm:$0xff] %v1193_v62  ;;  %v1214_v62 = vld [vmem:[%s878_s12 + $0x378] sm:$0xff] }
  0x57   : > { %2542 = vst [vmem:[#allocation52_spill] sm:$0xff] %v1196_v63  ;;  %v1217_v63 = vld [vmem:[%s878_s12 + $0x380] sm:$0xff] }
  0x58   : > { %2543 = vst [vmem:[#allocation53_spill] sm:$0xff] %v1199_v57  ;;  %v1220_v57 = vld [vmem:[%s878_s12 + $0x388] sm:$0xff] }
  0x59   : > { %2544 = vst [vmem:[#allocation54_spill] sm:$0xff] %v1202_v58  ;;  %v1223_v58 = vld [vmem:[%s878_s12 + $0x390] sm:$0xff] }
  0x5a   : > { %2545 = vst [vmem:[#allocation55_spill] sm:$0xff] %v1205_v59  ;;  %v1226_v59 = vld [vmem:[%s878_s12 + $0x398] sm:$0xff] }
  0x5b   : > { %2546 = vst [vmem:[#allocation56_spill] sm:$0xff] %v1208_v60  ;;  %v1229_v60 = vld [vmem:[%s878_s12 + $0x3a0] sm:$0xff] }
  0x5c   : > { %2547 = vst [vmem:[#allocation57_spill] sm:$0xff] %v1211_v61  ;;  %v1232_v61 = vld [vmem:[%s878_s12 + $0x3a8] sm:$0xff] }
  0x5d   : > { %2548 = vst [vmem:[#allocation58_spill] sm:$0xff] %v1214_v62  ;;  %v1235_v62 = vld [vmem:[%s878_s12 + $0x3b0] sm:$0xff] }
  0x5e   : > { %2549 = vst [vmem:[#allocation59_spill] sm:$0xff] %v1217_v63  ;;  %v1238_v63 = vld [vmem:[%s878_s12 + $0x3b8] sm:$0xff] }
  0x5f   : > { %2550 = vst [vmem:[#allocation60_spill] sm:$0xff] %v1220_v57  ;;  %v1241_v57 = vld [vmem:[%s878_s12 + $0x3c0] sm:$0xff] }
  0x60   : > { %2551 = vst [vmem:[#allocation61_spill] sm:$0xff] %v1223_v58  ;;  %v1244_v58 = vld [vmem:[%s878_s12 + $0x3c8] sm:$0xff] }
  0x61   : > { %2552 = vst [vmem:[#allocation62_spill] sm:$0xff] %v1226_v59  ;;  %v1247_v59 = vld [vmem:[%s878_s12 + $0x3d0] sm:$0xff] }
  0x62   : > { %2553 = vst [vmem:[#allocation63_spill] sm:$0xff] %v1229_v60  ;;  %v1250_v60 = vld [vmem:[%s878_s12 + $0x3d8] sm:$0xff] }
  0x63   : > { %2554 = vst [vmem:[#allocation64_spill] sm:$0xff] %v1232_v61  ;;  %v1253_v61 = vld [vmem:[%s878_s12 + $0x3e0] sm:$0xff] }
  0x64   : > { %2555 = vst [vmem:[#allocation65_spill] sm:$0xff] %v1235_v62  ;;  %v1256_v62 = vld [vmem:[%s878_s12 + $0x3e8] sm:$0xff] }
  0x65   : > { %2556 = vst [vmem:[#allocation66_spill] sm:$0xff] %v1238_v63  ;;  %v1259_v63 = vld [vmem:[%s878_s12 + $0x3f0] sm:$0xff] }
  0x66   : > { %2557 = vst [vmem:[#allocation67_spill] sm:$0xff] %v1241_v57  ;;  %v1262_v57 = vld [vmem:[%s878_s12 + $0x3f8] sm:$0xff] }
  0x67   : > { %2558 = vst [vmem:[#allocation68_spill] sm:$0xff] %v1244_v58  ;;  %v1265_v58 = vld [vmem:[%s878_s12 + $0x400] sm:$0xff] }
  0x68   : > { %2559 = vst [vmem:[#allocation69_spill] sm:$0xff] %v1247_v59  ;;  %v1268_v59 = vld [vmem:[%s878_s12 + $0x408] sm:$0xff] }
  0x69   : > { %2560 = vst [vmem:[#allocation70_spill] sm:$0xff] %v1250_v60  ;;  %v1271_v60 = vld [vmem:[%s878_s12 + $0x410] sm:$0xff] }
  0x6a   : > { %2561 = vst [vmem:[#allocation71_spill] sm:$0xff] %v1253_v61  ;;  %v1274_v61 = vld [vmem:[%s878_s12 + $0x418] sm:$0xff] }
  0x6b   : > { %2562 = vst [vmem:[#allocation72_spill] sm:$0xff] %v1256_v62  ;;  %v1277_v62 = vld [vmem:[%s878_s12 + $0x420] sm:$0xff] }
  0x6c   : > { %2563 = vst [vmem:[#allocation73_spill] sm:$0xff] %v1259_v63  ;;  %v1280_v63 = vld [vmem:[%s878_s12 + $0x428] sm:$0xff] }
  0x6d   : > { %2564 = vst [vmem:[#allocation74_spill] sm:$0xff] %v1262_v57  ;;  %v1283_v57 = vld [vmem:[%s878_s12 + $0x430] sm:$0xff] }
  0x6e   : > { %2565 = vst [vmem:[#allocation75_spill] sm:$0xff] %v1265_v58  ;;  %v1286_v58 = vld [vmem:[%s878_s12 + $0x438] sm:$0xff] }
  0x6f   : > { %2566 = vst [vmem:[#allocation76_spill] sm:$0xff] %v1268_v59  ;;  %v1289_v59 = vld [vmem:[%s878_s12 + $0x440] sm:$0xff] }
  0x70   : > { %2567 = vst [vmem:[#allocation77_spill] sm:$0xff] %v1271_v60  ;;  %v1292_v60 = vld [vmem:[%s878_s12 + $0x448] sm:$0xff] }
  0x71   : > { %2568 = vst [vmem:[#allocation78_spill] sm:$0xff] %v1274_v61  ;;  %v1295_v61 = vld [vmem:[%s878_s12 + $0x450] sm:$0xff] }
  0x72   : > { %2569 = vst [vmem:[#allocation79_spill] sm:$0xff] %v1277_v62  ;;  %v1298_v62 = vld [vmem:[%s878_s12 + $0x458] sm:$0xff] }
  0x73   : > { %2570 = vst [vmem:[#allocation80_spill] sm:$0xff] %v1280_v63  ;;  %v1301_v63 = vld [vmem:[%s878_s12 + $0x460] sm:$0xff] }
  0x74   : > { %2571 = vst [vmem:[#allocation81_spill] sm:$0xff] %v1283_v57  ;;  %v1304_v57 = vld [vmem:[%s878_s12 + $0x468] sm:$0xff] }
  0x75   : > { %2572 = vst [vmem:[#allocation82_spill] sm:$0xff] %v1286_v58  ;;  %v1307_v58 = vld [vmem:[%s878_s12 + $0x470] sm:$0xff] }
  0x76   : > { %2573 = vst [vmem:[#allocation83_spill] sm:$0xff] %v1289_v59  ;;  %v1310_v59 = vld [vmem:[%s878_s12 + $0x478] sm:$0xff] }
  0x77   : > { %2574 = vst [vmem:[#allocation84_spill] sm:$0xff] %v1292_v60  ;;  %v1313_v60 = vld [vmem:[%s878_s12 + $0x480] sm:$0xff] }
  0x78   : > { %2575 = vst [vmem:[#allocation85_spill] sm:$0xff] %v1295_v61  ;;  %v1316_v61 = vld [vmem:[%s878_s12 + $0x488] sm:$0xff] }
  0x79   : > { %2576 = vst [vmem:[#allocation86_spill] sm:$0xff] %v1298_v62  ;;  %v1319_v62 = vld [vmem:[%s878_s12 + $0x490] sm:$0xff] }
  0x7a   : > { %2577 = vst [vmem:[#allocation87_spill] sm:$0xff] %v1301_v63  ;;  %v1322_v63 = vld [vmem:[%s878_s12 + $0x498] sm:$0xff] }
  0x7b   : > { %2578 = vst [vmem:[#allocation88_spill] sm:$0xff] %v1304_v57  ;;  %v1325_v57 = vld [vmem:[%s878_s12 + $0x4a0] sm:$0xff] }
  0x7c   : > { %2579 = vst [vmem:[#allocation89_spill] sm:$0xff] %v1307_v58  ;;  %v1328_v58 = vld [vmem:[%s878_s12 + $0x4a8] sm:$0xff] }
  0x7d   : > { %2580 = vst [vmem:[#allocation90_spill] sm:$0xff] %v1310_v59  ;;  %v1331_v59 = vld [vmem:[%s878_s12 + $0x4b0] sm:$0xff] }
  0x7e   : > { %2581 = vst [vmem:[#allocation91_spill] sm:$0xff] %v1313_v60  ;;  %v1334_v60 = vld [vmem:[%s878_s12 + $0x4b8] sm:$0xff] }
  0x7f   : > { %2582 = vst [vmem:[#allocation92_spill] sm:$0xff] %v1316_v61  ;;  %v1337_v61 = vld [vmem:[%s878_s12 + $0x4c0] sm:$0xff] }
  0x80   : > { %2583 = vst [vmem:[#allocation93_spill] sm:$0xff] %v1319_v62  ;;  %v1340_v62 = vld [vmem:[%s878_s12 + $0x4c8] sm:$0xff] }
  0x81   : > { %2584 = vst [vmem:[#allocation94_spill] sm:$0xff] %v1322_v63  ;;  %v1343_v63 = vld [vmem:[%s878_s12 + $0x4d0] sm:$0xff] }
  0x82   : > { %2585 = vst [vmem:[#allocation95_spill] sm:$0xff] %v1325_v57  ;;  %v1346_v57 = vld [vmem:[%s878_s12 + $0x4d8] sm:$0xff] }
  0x83   : > { %2586 = vst [vmem:[#allocation96_spill] sm:$0xff] %v1328_v58  ;;  %v1349_v58 = vld [vmem:[%s878_s12 + $0x4e0] sm:$0xff] }
  0x84   : > { %2587 = vst [vmem:[#allocation97_spill] sm:$0xff] %v1331_v59  ;;  %v1352_v59 = vld [vmem:[%s878_s12 + $0x4e8] sm:$0xff] }
  0x85   : > { %2588 = vst [vmem:[#allocation98_spill] sm:$0xff] %v1334_v60  ;;  %v1355_v60 = vld [vmem:[%s878_s12 + $0x4f0] sm:$0xff] }
  0x86   : > { %2589 = vst [vmem:[#allocation99_spill] sm:$0xff] %v1337_v61  ;;  %v1358_v61 = vld [vmem:[%s878_s12 + $0x4f8] sm:$0xff] }
  0x87   : > { %2590 = vst [vmem:[#allocation100_spill] sm:$0xff] %v1340_v62  ;;  %v1361_v62 = vld [vmem:[%s878_s12 + $0x500] sm:$0xff] }
  0x88   : > { %2591 = vst [vmem:[#allocation101_spill] sm:$0xff] %v1343_v63  ;;  %v1364_v63 = vld [vmem:[%s878_s12 + $0x508] sm:$0xff] }
  0x89   : > { %2592 = vst [vmem:[#allocation102_spill] sm:$0xff] %v1346_v57  ;;  %v1367_v57 = vld [vmem:[%s878_s12 + $0x510] sm:$0xff] }
  0x8a   : > { %2593 = vst [vmem:[#allocation103_spill] sm:$0xff] %v1349_v58  ;;  %v1370_v58 = vld [vmem:[%s878_s12 + $0x518] sm:$0xff] }
  0x8b   : > { %2594 = vst [vmem:[#allocation104_spill] sm:$0xff] %v1352_v59  ;;  %v1373_v59 = vld [vmem:[%s878_s12 + $0x520] sm:$0xff] }
  0x8c   : > { %2595 = vst [vmem:[#allocation105_spill] sm:$0xff] %v1355_v60  ;;  %v1376_v60 = vld [vmem:[%s878_s12 + $0x528] sm:$0xff] }
  0x8d   : > { %2596 = vst [vmem:[#allocation106_spill] sm:$0xff] %v1358_v61  ;;  %v1379_v61 = vld [vmem:[%s878_s12 + $0x530] sm:$0xff] }
  0x8e   : > { %2597 = vst [vmem:[#allocation107_spill] sm:$0xff] %v1361_v62  ;;  %v1382_v62 = vld [vmem:[%s878_s12 + $0x538] sm:$0xff] }
  0x8f   : > { %2598 = vst [vmem:[#allocation108_spill] sm:$0xff] %v1364_v63  ;;  %v1385_v63 = vld [vmem:[%s878_s12 + $0x540] sm:$0xff] }
  0x90   : > { %2599 = vst [vmem:[#allocation109_spill] sm:$0xff] %v1367_v57  ;;  %v1388_v57 = vld [vmem:[%s878_s12 + $0x548] sm:$0xff] }
  0x91   : > { %2600 = vst [vmem:[#allocation110_spill] sm:$0xff] %v1370_v58  ;;  %v1391_v58 = vld [vmem:[%s878_s12 + $0x550] sm:$0xff] }
  0x92   : > { %2601 = vst [vmem:[#allocation111_spill] sm:$0xff] %v1373_v59  ;;  %v1394_v59 = vld [vmem:[%s878_s12 + $0x558] sm:$0xff] }
  0x93   : > { %2602 = vst [vmem:[#allocation112_spill] sm:$0xff] %v1376_v60  ;;  %v1397_v60 = vld [vmem:[%s878_s12 + $0x560] sm:$0xff] }
  0x94   : > { %2603 = vst [vmem:[#allocation113_spill] sm:$0xff] %v1379_v61  ;;  %v1400_v61 = vld [vmem:[%s878_s12 + $0x568] sm:$0xff] }
  0x95   : > { %2604 = vst [vmem:[#allocation114_spill] sm:$0xff] %v1382_v62  ;;  %v1403_v62 = vld [vmem:[%s878_s12 + $0x570] sm:$0xff] }
  0x96   : > { %2605 = vst [vmem:[#allocation115_spill] sm:$0xff] %v1385_v63  ;;  %v1406_v63 = vld [vmem:[%s878_s12 + $0x578] sm:$0xff] }
  0x97   : > { %2606 = vst [vmem:[#allocation116_spill] sm:$0xff] %v1388_v57  ;;  %v1409_v57 = vld [vmem:[%s878_s12 + $0x580] sm:$0xff] }
  0x98   : > { %2607 = vst [vmem:[#allocation117_spill] sm:$0xff] %v1391_v58  ;;  %v1412_v58 = vld [vmem:[%s878_s12 + $0x588] sm:$0xff] }
  0x99   : > { %2608 = vst [vmem:[#allocation118_spill] sm:$0xff] %v1394_v59  ;;  %v1415_v59 = vld [vmem:[%s878_s12 + $0x590] sm:$0xff] }
  0x9a   : > { %2609 = vst [vmem:[#allocation119_spill] sm:$0xff] %v1397_v60  ;;  %v1418_v60 = vld [vmem:[%s878_s12 + $0x598] sm:$0xff] }
  0x9b   : > { %2610 = vst [vmem:[#allocation120_spill] sm:$0xff] %v1400_v61  ;;  %v1421_v61 = vld [vmem:[%s878_s12 + $0x5a0] sm:$0xff] }
  0x9c   : > { %2611 = vst [vmem:[#allocation121_spill] sm:$0xff] %v1403_v62  ;;  %v1424_v62 = vld [vmem:[%s878_s12 + $0x5a8] sm:$0xff] }
  0x9d   : > { %2612 = vst [vmem:[#allocation122_spill] sm:$0xff] %v1406_v63  ;;  %v1427_v63 = vld [vmem:[%s878_s12 + $0x5b0] sm:$0xff] }
  0x9e   : > { %2613 = vst [vmem:[#allocation123_spill] sm:$0xff] %v1409_v57  ;;  %v1430_v57 = vld [vmem:[%s878_s12 + $0x5b8] sm:$0xff] }
  0x9f   : > { %2614 = vst [vmem:[#allocation124_spill] sm:$0xff] %v1412_v58  ;;  %v1433_v58 = vld [vmem:[%s878_s12 + $0x5c0] sm:$0xff] }
  0xa0   : > { %2615 = vst [vmem:[#allocation125_spill] sm:$0xff] %v1415_v59  ;;  %v1436_v59 = vld [vmem:[%s878_s12 + $0x5c8] sm:$0xff] }
  0xa1   : > { %2616 = vst [vmem:[#allocation126_spill] sm:$0xff] %v1418_v60  ;;  %v1439_v60 = vld [vmem:[%s878_s12 + $0x5d0] sm:$0xff] }
  0xa2   : > { %2617 = vst [vmem:[#allocation127_spill] sm:$0xff] %v1421_v61  ;;  %v1442_v61 = vld [vmem:[%s878_s12 + $0x5d8] sm:$0xff] }
  0xa3   : > { %2618 = vst [vmem:[#allocation128_spill] sm:$0xff] %v1424_v62  ;;  %v1445_v62 = vld [vmem:[%s878_s12 + $0x5e0] sm:$0xff] }
  0xa4   : > { %2619 = vst [vmem:[#allocation129_spill] sm:$0xff] %v1427_v63  ;;  %v1448_v63 = vld [vmem:[%s878_s12 + $0x5e8] sm:$0xff] }
  0xa5   : > { %2620 = vst [vmem:[#allocation130_spill] sm:$0xff] %v1430_v57  ;;  %v1451_v57 = vld [vmem:[%s878_s12 + $0x5f0] sm:$0xff] }
  0xa6   : > { %2621 = vst [vmem:[#allocation131_spill] sm:$0xff] %v1433_v58  ;;  %v1454_v58 = vld [vmem:[%s878_s12 + $0x5f8] sm:$0xff] }
  0xa7   : > { %2622 = vst [vmem:[#allocation132_spill] sm:$0xff] %v1436_v59  ;;  %v1457_v59 = vld [vmem:[%s878_s12 + $0x600] sm:$0xff] }
  0xa8   : > { %2623 = vst [vmem:[#allocation133_spill] sm:$0xff] %v1439_v60  ;;  %v1460_v60 = vld [vmem:[%s878_s12 + $0x608] sm:$0xff] }
  0xa9   : > { %2624 = vst [vmem:[#allocation134_spill] sm:$0xff] %v1442_v61  ;;  %v1463_v61 = vld [vmem:[%s878_s12 + $0x610] sm:$0xff] }
  0xaa   : > { %2625 = vst [vmem:[#allocation135_spill] sm:$0xff] %v1445_v62  ;;  %v1466_v62 = vld [vmem:[%s878_s12 + $0x618] sm:$0xff] }
  0xab   : > { %2626 = vst [vmem:[#allocation136_spill] sm:$0xff] %v1448_v63  ;;  %v1469_v63 = vld [vmem:[%s878_s12 + $0x620] sm:$0xff] }
  0xac   : > { %2627 = vst [vmem:[#allocation137_spill] sm:$0xff] %v1451_v57  ;;  %v1472_v57 = vld [vmem:[%s878_s12 + $0x628] sm:$0xff] }
  0xad   : > { %2628 = vst [vmem:[#allocation138_spill] sm:$0xff] %v1454_v58  ;;  %v1475_v58 = vld [vmem:[%s878_s12 + $0x630] sm:$0xff] }
  0xae   : > { %2629 = vst [vmem:[#allocation139_spill] sm:$0xff] %v1457_v59  ;;  %v1478_v59 = vld [vmem:[%s878_s12 + $0x638] sm:$0xff] }
  0xaf   : > { %2630 = vst [vmem:[#allocation140_spill] sm:$0xff] %v1460_v60  ;;  %v1481_v60 = vld [vmem:[%s878_s12 + $0x640] sm:$0xff] }
  0xb0   : > { %2631 = vst [vmem:[#allocation141_spill] sm:$0xff] %v1463_v61  ;;  %v1484_v61 = vld [vmem:[%s878_s12 + $0x648] sm:$0xff] }
  0xb1   : > { %2632 = vst [vmem:[#allocation142_spill] sm:$0xff] %v1466_v62  ;;  %v1487_v62 = vld [vmem:[%s878_s12 + $0x650] sm:$0xff] }
  0xb2   : > { %2633 = vst [vmem:[#allocation143_spill] sm:$0xff] %v1469_v63  ;;  %v1490_v63 = vld [vmem:[%s878_s12 + $0x658] sm:$0xff] }
  0xb3   : > { %2634 = vst [vmem:[#allocation144_spill] sm:$0xff] %v1472_v57  ;;  %v1493_v57 = vld [vmem:[%s878_s12 + $0x660] sm:$0xff] }
  0xb4   : > { %2635 = vst [vmem:[#allocation145_spill] sm:$0xff] %v1475_v58  ;;  %v1496_v58 = vld [vmem:[%s878_s12 + $0x668] sm:$0xff] }
  0xb5   : > { %2636 = vst [vmem:[#allocation146_spill] sm:$0xff] %v1478_v59  ;;  %v1499_v59 = vld [vmem:[%s878_s12 + $0x670] sm:$0xff] }
  0xb6   : > { %2637 = vst [vmem:[#allocation147_spill] sm:$0xff] %v1481_v60  ;;  %v1502_v60 = vld [vmem:[%s878_s12 + $0x678] sm:$0xff] }
  0xb7   : > { %2638 = vst [vmem:[#allocation148_spill] sm:$0xff] %v1484_v61  ;;  %v1505_v61 = vld [vmem:[%s878_s12 + $0x680] sm:$0xff] }
  0xb8   : > { %2639 = vst [vmem:[#allocation149_spill] sm:$0xff] %v1487_v62  ;;  %v1508_v62 = vld [vmem:[%s878_s12 + $0x688] sm:$0xff] }
  0xb9   : > { %2640 = vst [vmem:[#allocation150_spill] sm:$0xff] %v1490_v63  ;;  %v1511_v63 = vld [vmem:[%s878_s12 + $0x690] sm:$0xff] }
  0xba   : > { %2641 = vst [vmem:[#allocation151_spill] sm:$0xff] %v1493_v57  ;;  %v1514_v57 = vld [vmem:[%s878_s12 + $0x698] sm:$0xff] }
  0xbb   : > { %2642 = vst [vmem:[#allocation152_spill] sm:$0xff] %v1496_v58  ;;  %v1517_v58 = vld [vmem:[%s878_s12 + $0x6a0] sm:$0xff] }
  0xbc   : > { %2643 = vst [vmem:[#allocation153_spill] sm:$0xff] %v1499_v59  ;;  %v1520_v59 = vld [vmem:[%s878_s12 + $0x6a8] sm:$0xff] }
  0xbd   : > { %2644 = vst [vmem:[#allocation154_spill] sm:$0xff] %v1502_v60  ;;  %v1523_v60 = vld [vmem:[%s878_s12 + $0x6b0] sm:$0xff] }
  0xbe   : > { %2645 = vst [vmem:[#allocation155_spill] sm:$0xff] %v1505_v61  ;;  %v1526_v61 = vld [vmem:[%s878_s12 + $0x6b8] sm:$0xff] }
  0xbf   : > { %2646 = vst [vmem:[#allocation156_spill] sm:$0xff] %v1508_v62  ;;  %v1529_v62 = vld [vmem:[%s878_s12 + $0x6c0] sm:$0xff] }
  0xc0   : > { %2647 = vst [vmem:[#allocation157_spill] sm:$0xff] %v1511_v63  ;;  %v1532_v63 = vld [vmem:[%s878_s12 + $0x6c8] sm:$0xff] }
  0xc1   : > { %2648 = vst [vmem:[#allocation158_spill] sm:$0xff] %v1514_v57  ;;  %v1535_v57 = vld [vmem:[%s878_s12 + $0x6d0] sm:$0xff] }
  0xc2   : > { %2649 = vst [vmem:[#allocation159_spill] sm:$0xff] %v1517_v58  ;;  %v1538_v58 = vld [vmem:[%s878_s12 + $0x6d8] sm:$0xff] }
  0xc3   : > { %2650 = vst [vmem:[#allocation160_spill] sm:$0xff] %v1520_v59  ;;  %v1541_v59 = vld [vmem:[%s878_s12 + $0x6e0] sm:$0xff] }
  0xc4   : > { %2651 = vst [vmem:[#allocation161_spill] sm:$0xff] %v1523_v60  ;;  %v1544_v60 = vld [vmem:[%s878_s12 + $0x6e8] sm:$0xff] }
  0xc5   : > { %2652 = vst [vmem:[#allocation162_spill] sm:$0xff] %v1526_v61  ;;  %v1547_v61 = vld [vmem:[%s878_s12 + $0x6f0] sm:$0xff] }
  0xc6   : > { %2653 = vst [vmem:[#allocation163_spill] sm:$0xff] %v1529_v62  ;;  %v1550_v62 = vld [vmem:[%s878_s12 + $0x6f8] sm:$0xff] }
  0xc7   : > { %2654 = vst [vmem:[#allocation164_spill] sm:$0xff] %v1532_v63  ;;  %v1553_v63 = vld [vmem:[%s878_s12 + $0x700] sm:$0xff] }
  0xc8   : > { %2655 = vst [vmem:[#allocation165_spill] sm:$0xff] %v1535_v57  ;;  %v1556_v57 = vld [vmem:[%s878_s12 + $0x708] sm:$0xff] }
  0xc9   : > { %2656 = vst [vmem:[#allocation166_spill] sm:$0xff] %v1538_v58  ;;  %v1559_v58 = vld [vmem:[%s878_s12 + $0x710] sm:$0xff] }
  0xca   : > { %2657 = vst [vmem:[#allocation167_spill] sm:$0xff] %v1541_v59  ;;  %v1562_v59 = vld [vmem:[%s878_s12 + $0x718] sm:$0xff] }
  0xcb   : > { %2658 = vst [vmem:[#allocation168_spill] sm:$0xff] %v1544_v60  ;;  %v1565_v60 = vld [vmem:[%s878_s12 + $0x720] sm:$0xff] }
  0xcc   : > { %2659 = vst [vmem:[#allocation169_spill] sm:$0xff] %v1547_v61  ;;  %v1568_v61 = vld [vmem:[%s878_s12 + $0x728] sm:$0xff] }
  0xcd   : > { %2660 = vst [vmem:[#allocation170_spill] sm:$0xff] %v1550_v62  ;;  %v1571_v62 = vld [vmem:[%s878_s12 + $0x730] sm:$0xff] }
  0xce   : > { %2661 = vst [vmem:[#allocation171_spill] sm:$0xff] %v1553_v63  ;;  %v1574_v63 = vld [vmem:[%s878_s12 + $0x738] sm:$0xff] }
  0xcf   : > { %2662 = vst [vmem:[#allocation172_spill] sm:$0xff] %v1556_v57  ;;  %v1577_v57 = vld [vmem:[%s878_s12 + $0x740] sm:$0xff] }
  0xd0   : > { %2663 = vst [vmem:[#allocation173_spill] sm:$0xff] %v1559_v58  ;;  %v1580_v58 = vld [vmem:[%s878_s12 + $0x748] sm:$0xff] }
  0xd1   : > { %2664 = vst [vmem:[#allocation174_spill] sm:$0xff] %v1562_v59  ;;  %v1583_v59 = vld [vmem:[%s878_s12 + $0x750] sm:$0xff] }
  0xd2   : > { %2665 = vst [vmem:[#allocation175_spill] sm:$0xff] %v1565_v60  ;;  %v1586_v60 = vld [vmem:[%s878_s12 + $0x758] sm:$0xff] }
  0xd3   : > { %2666 = vst [vmem:[#allocation176_spill] sm:$0xff] %v1568_v61  ;;  %v1589_v61 = vld [vmem:[%s878_s12 + $0x760] sm:$0xff] }
  0xd4   : > { %2667 = vst [vmem:[#allocation177_spill] sm:$0xff] %v1571_v62  ;;  %v1592_v62 = vld [vmem:[%s878_s12 + $0x768] sm:$0xff] }
  0xd5   : > { %2668 = vst [vmem:[#allocation178_spill] sm:$0xff] %v1574_v63  ;;  %v1595_v63 = vld [vmem:[%s878_s12 + $0x770] sm:$0xff] }
  0xd6   : > { %2669 = vst [vmem:[#allocation179_spill] sm:$0xff] %v1577_v57  ;;  %v1598_v57 = vld [vmem:[%s878_s12 + $0x778] sm:$0xff] }
  0xd7   : > { %2670 = vst [vmem:[#allocation180_spill] sm:$0xff] %v1580_v58  ;;  %v1601_v58 = vld [vmem:[%s878_s12 + $0x780] sm:$0xff] }
  0xd8   : > { %2671 = vst [vmem:[#allocation181_spill] sm:$0xff] %v1583_v59  ;;  %v1604_v59 = vld [vmem:[%s878_s12 + $0x788] sm:$0xff] }
  0xd9   : > { %2672 = vst [vmem:[#allocation182_spill] sm:$0xff] %v1586_v60  ;;  %v1607_v60 = vld [vmem:[%s878_s12 + $0x790] sm:$0xff] }
  0xda   : > { %2673 = vst [vmem:[#allocation183_spill] sm:$0xff] %v1589_v61  ;;  %v1610_v61 = vld [vmem:[%s878_s12 + $0x798] sm:$0xff] }
  0xdb   : > { %2674 = vst [vmem:[#allocation184_spill] sm:$0xff] %v1592_v62  ;;  %v1613_v62 = vld [vmem:[%s878_s12 + $0x7a0] sm:$0xff] }
  0xdc   : > { %2675 = vst [vmem:[#allocation185_spill] sm:$0xff] %v1595_v63  ;;  %v1616_v63 = vld [vmem:[%s878_s12 + $0x7a8] sm:$0xff] }
  0xdd   : > { %2676 = vst [vmem:[#allocation186_spill] sm:$0xff] %v1598_v57  ;;  %v1619_v57 = vld [vmem:[%s878_s12 + $0x7b0] sm:$0xff] }
  0xde   : > { %2677 = vst [vmem:[#allocation187_spill] sm:$0xff] %v1601_v58  ;;  %v1622_v58 = vld [vmem:[%s878_s12 + $0x7b8] sm:$0xff] }
  0xdf   : > { %2678 = vst [vmem:[#allocation188_spill] sm:$0xff] %v1604_v59  ;;  %v1625_v59 = vld [vmem:[%s878_s12 + $0x7c0] sm:$0xff] }
  0xe0   : > { %2679 = vst [vmem:[#allocation189_spill] sm:$0xff] %v1607_v60  ;;  %v1628_v60 = vld [vmem:[%s878_s12 + $0x7c8] sm:$0xff] }
  0xe1   : > { %2680 = vst [vmem:[#allocation190_spill] sm:$0xff] %v1610_v61  ;;  %v1631_v61 = vld [vmem:[%s878_s12 + $0x7d0] sm:$0xff] }
  0xe2   : > { %2681 = vst [vmem:[#allocation191_spill] sm:$0xff] %v1613_v62  ;;  %v1634_v62 = vld [vmem:[%s878_s12 + $0x7d8] sm:$0xff] }
  0xe3   : > { %2682 = vst [vmem:[#allocation192_spill] sm:$0xff] %v1616_v63  ;;  %v1637_v63 = vld [vmem:[%s878_s12 + $0x7e0] sm:$0xff] }
  0xe4   : > { %2683 = vst [vmem:[#allocation193_spill] sm:$0xff] %v1619_v57  ;;  %v1640_v57 = vld [vmem:[%s878_s12 + $0x7e8] sm:$0xff] }
  0xe5   : > { %2684 = vst [vmem:[#allocation194_spill] sm:$0xff] %v1622_v58  ;;  %v1643_v58 = vld [vmem:[%s878_s12 + $0x7f0] sm:$0xff] }
  0xe6   : > { %2685 = vst [vmem:[#allocation195_spill] sm:$0xff] %v1625_v59  ;;  %v1646_v59 = vld [vmem:[%s878_s12 + $0x7f8] sm:$0xff] }
  0xe7   : > { %2686 = vst [vmem:[#allocation196_spill] sm:$0xff] %v1628_v60  ;;  %v1649_v60 = vld [vmem:[%s878_s12 + $0x800] sm:$0xff] }
  0xe8   : > { %2687 = vst [vmem:[#allocation197_spill] sm:$0xff] %v1631_v61  ;;  %v1652_v61 = vld [vmem:[%s878_s12 + $0x808] sm:$0xff] }
  0xe9   : > { %2688 = vst [vmem:[#allocation198_spill] sm:$0xff] %v1634_v62  ;;  %v1655_v62 = vld [vmem:[%s878_s12 + $0x810] sm:$0xff] }
  0xea   : > { %2689 = vst [vmem:[#allocation199_spill] sm:$0xff] %v1637_v63  ;;  %v1658_v63 = vld [vmem:[%s878_s12 + $0x818] sm:$0xff] }
  0xeb   : > { %2690 = vst [vmem:[#allocation200_spill] sm:$0xff] %v1640_v57  ;;  %v1661_v57 = vld [vmem:[%s878_s12 + $0x820] sm:$0xff] }
  0xec   : > { %2691 = vst [vmem:[#allocation201_spill] sm:$0xff] %v1643_v58  ;;  %v1664_v58 = vld [vmem:[%s878_s12 + $0x828] sm:$0xff] }
  0xed   : > { %2692 = vst [vmem:[#allocation202_spill] sm:$0xff] %v1646_v59  ;;  %v1667_v59 = vld [vmem:[%s878_s12 + $0x830] sm:$0xff] }
  0xee   : > { %2693 = vst [vmem:[#allocation203_spill] sm:$0xff] %v1649_v60  ;;  %v1670_v60 = vld [vmem:[%s878_s12 + $0x838] sm:$0xff] }
  0xef   : > { %2694 = vst [vmem:[#allocation204_spill] sm:$0xff] %v1652_v61  ;;  %v1673_v61 = vld [vmem:[%s878_s12 + $0x840] sm:$0xff] }
  0xf0   : > { %2695 = vst [vmem:[#allocation205_spill] sm:$0xff] %v1655_v62  ;;  %v1676_v62 = vld [vmem:[%s878_s12 + $0x848] sm:$0xff] }
  0xf1   : > { %2696 = vst [vmem:[#allocation206_spill] sm:$0xff] %v1658_v63  ;;  %v1679_v63 = vld [vmem:[%s878_s12 + $0x850] sm:$0xff] }
  0xf2   : > { %2697 = vst [vmem:[#allocation207_spill] sm:$0xff] %v1661_v57  ;;  %v1682_v57 = vld [vmem:[%s878_s12 + $0x858] sm:$0xff] }
  0xf3   : > { %2698 = vst [vmem:[#allocation208_spill] sm:$0xff] %v1664_v58  ;;  %v1685_v58 = vld [vmem:[%s878_s12 + $0x860] sm:$0xff] }
  0xf4   : > { %2699 = vst [vmem:[#allocation209_spill] sm:$0xff] %v1667_v59  ;;  %v1688_v59 = vld [vmem:[%s878_s12 + $0x868] sm:$0xff] }
  0xf5   : > { %2700 = vst [vmem:[#allocation210_spill] sm:$0xff] %v1670_v60  ;;  %v1691_v60 = vld [vmem:[%s878_s12 + $0x870] sm:$0xff] }
  0xf6   : > { %2701 = vst [vmem:[#allocation211_spill] sm:$0xff] %v1673_v61  ;;  %v1694_v61 = vld [vmem:[%s878_s12 + $0x878] sm:$0xff] }
  0xf7   : > { %2702 = vst [vmem:[#allocation212_spill] sm:$0xff] %v1676_v62  ;;  %v1697_v62 = vld [vmem:[%s878_s12 + $0x880] sm:$0xff] }
  0xf8   : > { %2703 = vst [vmem:[#allocation213_spill] sm:$0xff] %v1679_v63  ;;  %v1700_v63 = vld [vmem:[%s878_s12 + $0x888] sm:$0xff] }
  0xf9   : > { %2704 = vst [vmem:[#allocation214_spill] sm:$0xff] %v1682_v57  ;;  %v1703_v57 = vld [vmem:[%s878_s12 + $0x890] sm:$0xff] }
  0xfa   : > { %2705 = vst [vmem:[#allocation215_spill] sm:$0xff] %v1685_v58  ;;  %v1706_v58 = vld [vmem:[%s878_s12 + $0x898] sm:$0xff] }
  0xfb   : > { %2706 = vst [vmem:[#allocation216_spill] sm:$0xff] %v1688_v59  ;;  %v1709_v59 = vld [vmem:[%s878_s12 + $0x8a0] sm:$0xff] }
  0xfc   : > { %2707 = vst [vmem:[#allocation217_spill] sm:$0xff] %v1691_v60  ;;  %v1712_v60 = vld [vmem:[%s878_s12 + $0x8a8] sm:$0xff] }
  0xfd   : > { %2708 = vst [vmem:[#allocation218_spill] sm:$0xff] %v1694_v61  ;;  %v1715_v61 = vld [vmem:[%s878_s12 + $0x8b0] sm:$0xff] }
  0xfe   : > { %2709 = vst [vmem:[#allocation219_spill] sm:$0xff] %v1697_v62  ;;  %v1718_v62 = vld [vmem:[%s878_s12 + $0x8b8] sm:$0xff] }
  0xff   : > { %2710 = vst [vmem:[#allocation220_spill] sm:$0xff] %v1700_v63  ;;  %v1721_v63 = vld [vmem:[%s878_s12 + $0x8c0] sm:$0xff] }
 0x100   : > { %2711 = vst [vmem:[#allocation221_spill] sm:$0xff] %v1703_v57  ;;  %v1724_v57 = vld [vmem:[%s878_s12 + $0x8c8] sm:$0xff] }
 0x101   : > { %2712 = vst [vmem:[#allocation222_spill] sm:$0xff] %v1706_v58  ;;  %v1727_v58 = vld [vmem:[%s878_s12 + $0x8d0] sm:$0xff] }
 0x102   : > { %2713 = vst [vmem:[#allocation223_spill] sm:$0xff] %v1709_v59  ;;  %v1730_v59 = vld [vmem:[%s878_s12 + $0x8d8] sm:$0xff] }
 0x103   : > { %2714 = vst [vmem:[#allocation224_spill] sm:$0xff] %v1712_v60  ;;  %v1733_v60 = vld [vmem:[%s878_s12 + $0x8e0] sm:$0xff] }
 0x104   : > { %2715 = vst [vmem:[#allocation225_spill] sm:$0xff] %v1715_v61  ;;  %v1736_v61 = vld [vmem:[%s878_s12 + $0x8e8] sm:$0xff] }
 0x105   : > { %2716 = vst [vmem:[#allocation226_spill] sm:$0xff] %v1718_v62  ;;  %v1739_v62 = vld [vmem:[%s878_s12 + $0x8f0] sm:$0xff] }
 0x106   : > { %2717 = vst [vmem:[#allocation227_spill] sm:$0xff] %v1721_v63  ;;  %v1742_v63 = vld [vmem:[%s878_s12 + $0x8f8] sm:$0xff] }
 0x107   : > { %2718 = vst [vmem:[#allocation228_spill] sm:$0xff] %v1724_v57  ;;  %v1745_v57 = vld [vmem:[%s878_s12 + $0x900] sm:$0xff] }
 0x108   : > { %2719 = vst [vmem:[#allocation229_spill] sm:$0xff] %v1727_v58  ;;  %v1748_v58 = vld [vmem:[%s878_s12 + $0x908] sm:$0xff] }
 0x109   : > { %2720 = vst [vmem:[#allocation230_spill] sm:$0xff] %v1730_v59  ;;  %v1751_v59 = vld [vmem:[%s878_s12 + $0x910] sm:$0xff] }
 0x10a   : > { %2721 = vst [vmem:[#allocation231_spill] sm:$0xff] %v1733_v60  ;;  %v1754_v60 = vld [vmem:[%s878_s12 + $0x918] sm:$0xff] }
 0x10b   : > { %2722 = vst [vmem:[#allocation232_spill] sm:$0xff] %v1736_v61  ;;  %v1757_v61 = vld [vmem:[%s878_s12 + $0x920] sm:$0xff] }
 0x10c   : > { %2723 = vst [vmem:[#allocation233_spill] sm:$0xff] %v1739_v62  ;;  %v1760_v62 = vld [vmem:[%s878_s12 + $0x928] sm:$0xff] }
 0x10d   : > { %2724 = vst [vmem:[#allocation234_spill] sm:$0xff] %v1742_v63  ;;  %v1763_v63 = vld [vmem:[%s878_s12 + $0x930] sm:$0xff] }
 0x10e   : > { %2725 = vst [vmem:[#allocation235_spill] sm:$0xff] %v1745_v57  ;;  %v1766_v57 = vld [vmem:[%s878_s12 + $0x938] sm:$0xff] }
 0x10f   : > { %2726 = vst [vmem:[#allocation236_spill] sm:$0xff] %v1748_v58  ;;  %v1769_v58 = vld [vmem:[%s878_s12 + $0x940] sm:$0xff] }
 0x110   : > { %2727 = vst [vmem:[#allocation237_spill] sm:$0xff] %v1751_v59  ;;  %v1772_v59 = vld [vmem:[%s878_s12 + $0x948] sm:$0xff] }
 0x111   : > { %2728 = vst [vmem:[#allocation238_spill] sm:$0xff] %v1754_v60  ;;  %v1775_v60 = vld [vmem:[%s878_s12 + $0x950] sm:$0xff] }
 0x112   : > { %2729 = vst [vmem:[#allocation239_spill] sm:$0xff] %v1757_v61  ;;  %v1778_v61 = vld [vmem:[%s878_s12 + $0x958] sm:$0xff] }
 0x113   : > { %2730 = vst [vmem:[#allocation240_spill] sm:$0xff] %v1760_v62  ;;  %v1781_v62 = vld [vmem:[%s878_s12 + $0x960] sm:$0xff] }
 0x114   : > { %2731 = vst [vmem:[#allocation241_spill] sm:$0xff] %v1763_v63  ;;  %v1784_v63 = vld [vmem:[%s878_s12 + $0x968] sm:$0xff] }
 0x115   : > { %2732 = vst [vmem:[#allocation242_spill] sm:$0xff] %v1766_v57  ;;  %v1787_v57 = vld [vmem:[%s878_s12 + $0x970] sm:$0xff] }
 0x116   : > { %2733 = vst [vmem:[#allocation243_spill] sm:$0xff] %v1769_v58  ;;  %v1790_v58 = vld [vmem:[%s878_s12 + $0x978] sm:$0xff] }
 0x117   : > { %2734 = vst [vmem:[#allocation244_spill] sm:$0xff] %v1772_v59  ;;  %v1793_v59 = vld [vmem:[%s878_s12 + $0x980] sm:$0xff] }
 0x118   : > { %2735 = vst [vmem:[#allocation245_spill] sm:$0xff] %v1775_v60  ;;  %v1796_v60 = vld [vmem:[%s878_s12 + $0x988] sm:$0xff] }
 0x119   : > { %2736 = vst [vmem:[#allocation246_spill] sm:$0xff] %v1778_v61  ;;  %v1802_v61 = vld [vmem:[%s878_s12 + $0x998] sm:$0xff] }
 0x11a   : > { %2737 = vst [vmem:[#allocation247_spill] sm:$0xff] %v1781_v62  ;;  %v1805_v62 = vld [vmem:[%s878_s12 + $0x9a0] sm:$0xff] }
 0x11b   : > { %2738 = vst [vmem:[#allocation248_spill] sm:$0xff] %v1784_v63  ;;  %v1811_v63 = vld [vmem:[%s878_s12 + $0x9b0] sm:$0xff] }
 0x11c   : > { %2739 = vst [vmem:[#allocation249_spill] sm:$0xff] %v1787_v57  ;;  %v1814_v57 = vld [vmem:[%s878_s12 + $0x9b8] sm:$0xff] }
 0x11d   : > { %2740 = vst [vmem:[#allocation250_spill] sm:$0xff] %v1796_v60  ;;  %v1842_v60 = vld [vmem:[%s878_s12 + $0x9f0] sm:$0xff] }
 0x11e   : > { %2741 = vst [vmem:[#allocation251_spill] sm:$0xff] %v1799_v56  ;;  %v1839_v56 = vld [vmem:[%s878_s12 + $0x9e8] sm:$0xff] }
 0x11f   : > { %2742 = vst [vmem:[#allocation252_spill] sm:$0xff] %v1802_v61  ;;  %v1836_v61 = vld [vmem:[%s878_s12 + $0x9e0] sm:$0xff] }
 0x120   : > { %2743 = vst [vmem:[#allocation253_spill] sm:$0xff] %v1805_v62  ;;  %v1824_v62 = vld [vmem:[%s878_s12 + $0x9c0] sm:$0xff] }
 0x121   : > { %2744 = vst [vmem:[#allocation254_spill] sm:$0xff] %v1808_v55  ;;  %v1833_v55 = vld [vmem:[%s878_s12 + $0x9d8] sm:$0xff] }
 0x122   : > { %2745 = vst [vmem:[#allocation255_spill] sm:$0xff] %v1811_v63  ;;  %v1827_v63 = vld [vmem:[%s878_s12 + $0x9c8] sm:$0xff] }
 0x123   : > { %2746 = vst [vmem:[#allocation256_spill] sm:$0xff] %v1814_v57  ;;  %v1830_v57 = vld [vmem:[%s878_s12 + $0x9d0] sm:$0xff] }
 0x124   : > { %2747 = vst [vmem:[#allocation257_spill] sm:$0xff] %v1824_v62  ;;  %v1845_v62 = vld [vmem:[%s878_s12 + $0x9f8] sm:$0xff] }
 0x125   : > { %445 = vst [vmem:[%s1821_s15] sm:$0xff] %v881_v0  ;;  %v2748_v0 = vld [vmem:[#allocation2_spill] sm:$0xff] }
 0x126   : > { %446 = vst [vmem:[%s1821_s15 + $0x8] sm:$0xff] %v884_v1  ;;  %v2749_v1 = vld [vmem:[#allocation3_spill] sm:$0xff] }
 0x127   : > { %447 = vst [vmem:[%s1821_s15 + $0x10] sm:$0xff] %v887_v2  ;;  %v2750_v2 = vld [vmem:[#allocation4_spill] sm:$0xff] }
 0x128   : > { %448 = vst [vmem:[%s1821_s15 + $0x18] sm:$0xff] %v890_v3  ;;  %v2751_v3 = vld [vmem:[#allocation5_spill] sm:$0xff] }
 0x129   : > { %449 = vst [vmem:[%s1821_s15 + $0x20] sm:$0xff] %v893_v4  ;;  %v2752_v4 = vld [vmem:[#allocation6_spill] sm:$0xff] }
 0x12a   : > { %450 = vst [vmem:[%s1821_s15 + $0x28] sm:$0xff] %v896_v5  ;;  %v2753_v5 = vld [vmem:[#allocation7_spill] sm:$0xff] }
 0x12b   : > { %451 = vst [vmem:[%s1821_s15 + $0x30] sm:$0xff] %v899_v6  ;;  %v2754_v6 = vld [vmem:[#allocation8_spill] sm:$0xff] }
 0x12c   : > { %452 = vst [vmem:[%s1821_s15 + $0x38] sm:$0xff] %v902_v7  ;;  %v2755_v7 = vld [vmem:[#allocation9_spill] sm:$0xff] }
 0x12d   : > { %453 = vst [vmem:[%s1821_s15 + $0x40] sm:$0xff] %v905_v8  ;;  %v2756_v8 = vld [vmem:[#allocation10_spill] sm:$0xff] }
 0x12e   : > { %454 = vst [vmem:[%s1821_s15 + $0x48] sm:$0xff] %v908_v9  ;;  %v2757_v9 = vld [vmem:[#allocation11_spill] sm:$0xff] }
 0x12f   : > { %455 = vst [vmem:[%s1821_s15 + $0x50] sm:$0xff] %v911_v10  ;;  %v2758_v10 = vld [vmem:[#allocation12_spill] sm:$0xff] }
 0x130   : > { %456 = vst [vmem:[%s1821_s15 + $0x58] sm:$0xff] %v914_v11  ;;  %v2759_v11 = vld [vmem:[#allocation13_spill] sm:$0xff] }
 0x131   : > { %457 = vst [vmem:[%s1821_s15 + $0x60] sm:$0xff] %v917_v12  ;;  %v2760_v12 = vld [vmem:[#allocation14_spill] sm:$0xff] }
 0x132   : > { %458 = vst [vmem:[%s1821_s15 + $0x68] sm:$0xff] %v920_v13  ;;  %v2761_v13 = vld [vmem:[#allocation15_spill] sm:$0xff] }
 0x133   : > { %459 = vst [vmem:[%s1821_s15 + $0x70] sm:$0xff] %v923_v14  ;;  %v2762_v14 = vld [vmem:[#allocation16_spill] sm:$0xff] }
 0x134   : > { %460 = vst [vmem:[%s1821_s15 + $0x78] sm:$0xff] %v926_v15  ;;  %v2763_v15 = vld [vmem:[#allocation17_spill] sm:$0xff] }
 0x135   : > { %461 = vst [vmem:[%s1821_s15 + $0x80] sm:$0xff] %v929_v16  ;;  %v2764_v16 = vld [vmem:[#allocation18_spill] sm:$0xff] }
 0x136   : > { %462 = vst [vmem:[%s1821_s15 + $0x88] sm:$0xff] %v932_v17  ;;  %v2765_v17 = vld [vmem:[#allocation19_spill] sm:$0xff] }
 0x137   : > { %463 = vst [vmem:[%s1821_s15 + $0x90] sm:$0xff] %v935_v18  ;;  %v2766_v18 = vld [vmem:[#allocation20_spill] sm:$0xff] }
 0x138   : > { %464 = vst [vmem:[%s1821_s15 + $0x98] sm:$0xff] %v938_v19  ;;  %v2767_v19 = vld [vmem:[#allocation21_spill] sm:$0xff] }
 0x139   : > { %465 = vst [vmem:[%s1821_s15 + $0xa0] sm:$0xff] %v941_v20  ;;  %v2768_v20 = vld [vmem:[#allocation22_spill] sm:$0xff] }
 0x13a   : > { %466 = vst [vmem:[%s1821_s15 + $0xa8] sm:$0xff] %v944_v21  ;;  %v2769_v21 = vld [vmem:[#allocation23_spill] sm:$0xff] }
 0x13b   : > { %467 = vst [vmem:[%s1821_s15 + $0xb0] sm:$0xff] %v947_v22  ;;  %v2770_v22 = vld [vmem:[#allocation24_spill] sm:$0xff] }
 0x13c   : > { %468 = vst [vmem:[%s1821_s15 + $0xb8] sm:$0xff] %v950_v23  ;;  %v2771_v23 = vld [vmem:[#allocation25_spill] sm:$0xff] }
 0x13d   : > { %469 = vst [vmem:[%s1821_s15 + $0xc0] sm:$0xff] %v953_v24  ;;  %v2772_v24 = vld [vmem:[#allocation26_spill] sm:$0xff] }
 0x13e   : > { %470 = vst [vmem:[%s1821_s15 + $0xc8] sm:$0xff] %v956_v25  ;;  %v2773_v25 = vld [vmem:[#allocation27_spill] sm:$0xff] }
 0x13f   : > { %471 = vst [vmem:[%s1821_s15 + $0xd0] sm:$0xff] %v959_v26  ;;  %v2774_v26 = vld [vmem:[#allocation28_spill] sm:$0xff] }
 0x140   : > { %472 = vst [vmem:[%s1821_s15 + $0xd8] sm:$0xff] %v962_v27  ;;  %v2775_v27 = vld [vmem:[#allocation29_spill] sm:$0xff] }
 0x141   : > { %473 = vst [vmem:[%s1821_s15 + $0xe0] sm:$0xff] %v965_v28  ;;  %v2776_v28 = vld [vmem:[#allocation30_spill] sm:$0xff] }
 0x142   : > { %474 = vst [vmem:[%s1821_s15 + $0xe8] sm:$0xff] %v968_v29  ;;  %v2777_v29 = vld [vmem:[#allocation31_spill] sm:$0xff] }
 0x143   : > { %475 = vst [vmem:[%s1821_s15 + $0xf0] sm:$0xff] %v971_v30  ;;  %v2778_v30 = vld [vmem:[#allocation32_spill] sm:$0xff] }
 0x144   : > { %476 = vst [vmem:[%s1821_s15 + $0xf8] sm:$0xff] %v974_v31  ;;  %v2779_v31 = vld [vmem:[#allocation33_spill] sm:$0xff] }
 0x145   : > { %477 = vst [vmem:[%s1821_s15 + $0x100] sm:$0xff] %v977_v32  ;;  %v2780_v32 = vld [vmem:[#allocation34_spill] sm:$0xff] }
 0x146   : > { %478 = vst [vmem:[%s1821_s15 + $0x108] sm:$0xff] %v980_v33  ;;  %v2781_v33 = vld [vmem:[#allocation35_spill] sm:$0xff] }
 0x147   : > { %479 = vst [vmem:[%s1821_s15 + $0x110] sm:$0xff] %v983_v34  ;;  %v2782_v34 = vld [vmem:[#allocation36_spill] sm:$0xff] }
 0x148   : > { %480 = vst [vmem:[%s1821_s15 + $0x118] sm:$0xff] %v986_v35  ;;  %v2783_v35 = vld [vmem:[#allocation37_spill] sm:$0xff] }
 0x149   : > { %481 = vst [vmem:[%s1821_s15 + $0x120] sm:$0xff] %v989_v36  ;;  %v2784_v36 = vld [vmem:[#allocation38_spill] sm:$0xff] }
 0x14a   : > { %482 = vst [vmem:[%s1821_s15 + $0x128] sm:$0xff] %v992_v37  ;;  %v2785_v37 = vld [vmem:[#allocation39_spill] sm:$0xff] }
 0x14b   : > { %483 = vst [vmem:[%s1821_s15 + $0x130] sm:$0xff] %v995_v38  ;;  %v2786_v38 = vld [vmem:[#allocation40_spill] sm:$0xff] }
 0x14c   : > { %484 = vst [vmem:[%s1821_s15 + $0x138] sm:$0xff] %v998_v39  ;;  %v2787_v39 = vld [vmem:[#allocation41_spill] sm:$0xff] }
 0x14d   : > { %485 = vst [vmem:[%s1821_s15 + $0x140] sm:$0xff] %v1001_v40  ;;  %v2788_v40 = vld [vmem:[#allocation42_spill] sm:$0xff] }
 0x14e   : > { %486 = vst [vmem:[%s1821_s15 + $0x148] sm:$0xff] %v1004_v41  ;;  %v2789_v41 = vld [vmem:[#allocation43_spill] sm:$0xff] }
 0x14f   : > { %487 = vst [vmem:[%s1821_s15 + $0x150] sm:$0xff] %v1007_v42  ;;  %v2790_v42 = vld [vmem:[#allocation44_spill] sm:$0xff] }
 0x150   : > { %488 = vst [vmem:[%s1821_s15 + $0x158] sm:$0xff] %v1010_v43  ;;  %v2791_v43 = vld [vmem:[#allocation45_spill] sm:$0xff] }
 0x151   : > { %489 = vst [vmem:[%s1821_s15 + $0x160] sm:$0xff] %v1013_v44  ;;  %v2792_v44 = vld [vmem:[#allocation46_spill] sm:$0xff] }
 0x152   : > { %490 = vst [vmem:[%s1821_s15 + $0x168] sm:$0xff] %v1016_v45  ;;  %v2793_v45 = vld [vmem:[#allocation47_spill] sm:$0xff] }
 0x153   : > { %491 = vst [vmem:[%s1821_s15 + $0x170] sm:$0xff] %v1019_v46  ;;  %v2794_v46 = vld [vmem:[#allocation48_spill] sm:$0xff] }
 0x154   : > { %492 = vst [vmem:[%s1821_s15 + $0x178] sm:$0xff] %v1022_v47  ;;  %v2795_v47 = vld [vmem:[#allocation49_spill] sm:$0xff] }
 0x155   : > { %493 = vst [vmem:[%s1821_s15 + $0x180] sm:$0xff] %v1025_v48  ;;  %v2796_v48 = vld [vmem:[#allocation50_spill] sm:$0xff] }
 0x156   : > { %494 = vst [vmem:[%s1821_s15 + $0x188] sm:$0xff] %v1028_v49  ;;  %v2797_v49 = vld [vmem:[#allocation51_spill] sm:$0xff] }
 0x157   : > { %495 = vst [vmem:[%s1821_s15 + $0x190] sm:$0xff] %v1031_v50  ;;  %v2798_v50 = vld [vmem:[#allocation52_spill] sm:$0xff] }
 0x158   : > { %496 = vst [vmem:[%s1821_s15 + $0x198] sm:$0xff] %v1034_v51  ;;  %v2799_v51 = vld [vmem:[#allocation53_spill] sm:$0xff] }
 0x159   : > { %497 = vst [vmem:[%s1821_s15 + $0x1a0] sm:$0xff] %v1037_v52  ;;  %v2800_v52 = vld [vmem:[#allocation54_spill] sm:$0xff] }
 0x15a   : > { %498 = vst [vmem:[%s1821_s15 + $0x1a8] sm:$0xff] %v1040_v53  ;;  %v2801_v53 = vld [vmem:[#allocation55_spill] sm:$0xff] }
 0x15b   : > { %499 = vst [vmem:[%s1821_s15 + $0x1b0] sm:$0xff] %v1043_v54  ;;  %v2802_v54 = vld [vmem:[#allocation56_spill] sm:$0xff] }
 0x15c   : > { %500 = vst [vmem:[%s1821_s15 + $0x1b8] sm:$0xff] %v2748_v0  ;;  %v2803_v0 = vld [vmem:[#allocation57_spill] sm:$0xff] }
 0x15d   : > { %501 = vst [vmem:[%s1821_s15 + $0x1c0] sm:$0xff] %v2749_v1  ;;  %v2804_v1 = vld [vmem:[#allocation58_spill] sm:$0xff] }
 0x15e   : > { %502 = vst [vmem:[%s1821_s15 + $0x1c8] sm:$0xff] %v2750_v2  ;;  %v2805_v2 = vld [vmem:[#allocation59_spill] sm:$0xff] }
 0x15f   : > { %503 = vst [vmem:[%s1821_s15 + $0x1d0] sm:$0xff] %v2751_v3  ;;  %v2806_v3 = vld [vmem:[#allocation60_spill] sm:$0xff] }
 0x160   : > { %504 = vst [vmem:[%s1821_s15 + $0x1d8] sm:$0xff] %v2752_v4  ;;  %v2807_v4 = vld [vmem:[#allocation61_spill] sm:$0xff] }
 0x161   : > { %505 = vst [vmem:[%s1821_s15 + $0x1e0] sm:$0xff] %v2753_v5  ;;  %v2808_v5 = vld [vmem:[#allocation62_spill] sm:$0xff] }
 0x162   : > { %506 = vst [vmem:[%s1821_s15 + $0x1e8] sm:$0xff] %v2754_v6  ;;  %v2809_v6 = vld [vmem:[#allocation63_spill] sm:$0xff] }
 0x163   : > { %507 = vst [vmem:[%s1821_s15 + $0x1f0] sm:$0xff] %v2755_v7  ;;  %v2810_v7 = vld [vmem:[#allocation64_spill] sm:$0xff] }
 0x164   : > { %508 = vst [vmem:[%s1821_s15 + $0x1f8] sm:$0xff] %v2756_v8  ;;  %v2811_v8 = vld [vmem:[#allocation65_spill] sm:$0xff] }
 0x165   : > { %509 = vst [vmem:[%s1821_s15 + $0x200] sm:$0xff] %v2757_v9  ;;  %v2812_v9 = vld [vmem:[#allocation66_spill] sm:$0xff] }
 0x166   : > { %510 = vst [vmem:[%s1821_s15 + $0x208] sm:$0xff] %v2758_v10  ;;  %v2813_v10 = vld [vmem:[#allocation67_spill] sm:$0xff] }
 0x167   : > { %511 = vst [vmem:[%s1821_s15 + $0x210] sm:$0xff] %v2759_v11  ;;  %v2814_v11 = vld [vmem:[#allocation68_spill] sm:$0xff] }
 0x168   : > { %512 = vst [vmem:[%s1821_s15 + $0x218] sm:$0xff] %v2760_v12  ;;  %v2815_v12 = vld [vmem:[#allocation69_spill] sm:$0xff] }
 0x169   : > { %513 = vst [vmem:[%s1821_s15 + $0x220] sm:$0xff] %v2761_v13  ;;  %v2816_v13 = vld [vmem:[#allocation70_spill] sm:$0xff] }
 0x16a   : > { %514 = vst [vmem:[%s1821_s15 + $0x228] sm:$0xff] %v2762_v14  ;;  %v2817_v14 = vld [vmem:[#allocation71_spill] sm:$0xff] }
 0x16b   : > { %515 = vst [vmem:[%s1821_s15 + $0x230] sm:$0xff] %v2763_v15  ;;  %v2818_v15 = vld [vmem:[#allocation72_spill] sm:$0xff] }
 0x16c   : > { %516 = vst [vmem:[%s1821_s15 + $0x238] sm:$0xff] %v2764_v16  ;;  %v2819_v16 = vld [vmem:[#allocation73_spill] sm:$0xff] }
 0x16d   : > { %517 = vst [vmem:[%s1821_s15 + $0x240] sm:$0xff] %v2765_v17  ;;  %v2820_v17 = vld [vmem:[#allocation74_spill] sm:$0xff] }
 0x16e   : > { %518 = vst [vmem:[%s1821_s15 + $0x248] sm:$0xff] %v2766_v18  ;;  %v2821_v18 = vld [vmem:[#allocation75_spill] sm:$0xff] }
 0x16f   : > { %519 = vst [vmem:[%s1821_s15 + $0x250] sm:$0xff] %v2767_v19  ;;  %v2822_v19 = vld [vmem:[#allocation76_spill] sm:$0xff] }
 0x170   : > { %520 = vst [vmem:[%s1821_s15 + $0x258] sm:$0xff] %v2768_v20  ;;  %v2823_v20 = vld [vmem:[#allocation77_spill] sm:$0xff] }
 0x171   : > { %521 = vst [vmem:[%s1821_s15 + $0x260] sm:$0xff] %v2769_v21  ;;  %v2824_v21 = vld [vmem:[#allocation78_spill] sm:$0xff] }
 0x172   : > { %522 = vst [vmem:[%s1821_s15 + $0x268] sm:$0xff] %v2770_v22  ;;  %v2825_v22 = vld [vmem:[#allocation79_spill] sm:$0xff] }
 0x173   : > { %523 = vst [vmem:[%s1821_s15 + $0x270] sm:$0xff] %v2771_v23  ;;  %v2826_v23 = vld [vmem:[#allocation80_spill] sm:$0xff] }
 0x174   : > { %524 = vst [vmem:[%s1821_s15 + $0x278] sm:$0xff] %v2772_v24  ;;  %v2827_v24 = vld [vmem:[#allocation81_spill] sm:$0xff] }
 0x175   : > { %525 = vst [vmem:[%s1821_s15 + $0x280] sm:$0xff] %v2773_v25  ;;  %v2828_v25 = vld [vmem:[#allocation82_spill] sm:$0xff] }
 0x176   : > { %526 = vst [vmem:[%s1821_s15 + $0x288] sm:$0xff] %v2774_v26  ;;  %v2829_v26 = vld [vmem:[#allocation83_spill] sm:$0xff] }
 0x177   : > { %527 = vst [vmem:[%s1821_s15 + $0x290] sm:$0xff] %v2775_v27  ;;  %v2830_v27 = vld [vmem:[#allocation84_spill] sm:$0xff] }
 0x178   : > { %528 = vst [vmem:[%s1821_s15 + $0x298] sm:$0xff] %v2776_v28  ;;  %v2831_v28 = vld [vmem:[#allocation85_spill] sm:$0xff] }
 0x179   : > { %529 = vst [vmem:[%s1821_s15 + $0x2a0] sm:$0xff] %v2777_v29  ;;  %v2832_v29 = vld [vmem:[#allocation86_spill] sm:$0xff] }
 0x17a   : > { %530 = vst [vmem:[%s1821_s15 + $0x2a8] sm:$0xff] %v2778_v30  ;;  %v2833_v30 = vld [vmem:[#allocation87_spill] sm:$0xff] }
 0x17b   : > { %531 = vst [vmem:[%s1821_s15 + $0x2b0] sm:$0xff] %v2779_v31  ;;  %v2834_v31 = vld [vmem:[#allocation88_spill] sm:$0xff] }
 0x17c   : > { %532 = vst [vmem:[%s1821_s15 + $0x2b8] sm:$0xff] %v2780_v32  ;;  %v2835_v32 = vld [vmem:[#allocation89_spill] sm:$0xff] }
 0x17d   : > { %533 = vst [vmem:[%s1821_s15 + $0x2c0] sm:$0xff] %v2781_v33  ;;  %v2836_v33 = vld [vmem:[#allocation90_spill] sm:$0xff] }
 0x17e   : > { %534 = vst [vmem:[%s1821_s15 + $0x2c8] sm:$0xff] %v2782_v34  ;;  %v2837_v34 = vld [vmem:[#allocation91_spill] sm:$0xff] }
 0x17f   : > { %535 = vst [vmem:[%s1821_s15 + $0x2d0] sm:$0xff] %v2783_v35  ;;  %v2838_v35 = vld [vmem:[#allocation92_spill] sm:$0xff] }
 0x180   : > { %536 = vst [vmem:[%s1821_s15 + $0x2d8] sm:$0xff] %v2784_v36  ;;  %v2839_v36 = vld [vmem:[#allocation93_spill] sm:$0xff] }
 0x181   : > { %537 = vst [vmem:[%s1821_s15 + $0x2e0] sm:$0xff] %v2785_v37  ;;  %v2840_v37 = vld [vmem:[#allocation94_spill] sm:$0xff] }
 0x182   : > { %538 = vst [vmem:[%s1821_s15 + $0x2e8] sm:$0xff] %v2786_v38  ;;  %v2841_v38 = vld [vmem:[#allocation95_spill] sm:$0xff] }
 0x183   : > { %539 = vst [vmem:[%s1821_s15 + $0x2f0] sm:$0xff] %v2787_v39  ;;  %v2842_v39 = vld [vmem:[#allocation96_spill] sm:$0xff] }
 0x184   : > { %540 = vst [vmem:[%s1821_s15 + $0x2f8] sm:$0xff] %v2788_v40  ;;  %v2843_v40 = vld [vmem:[#allocation97_spill] sm:$0xff] }
 0x185   : > { %541 = vst [vmem:[%s1821_s15 + $0x300] sm:$0xff] %v2789_v41  ;;  %v2844_v41 = vld [vmem:[#allocation98_spill] sm:$0xff] }
 0x186   : > { %542 = vst [vmem:[%s1821_s15 + $0x308] sm:$0xff] %v2790_v42  ;;  %v2845_v42 = vld [vmem:[#allocation99_spill] sm:$0xff] }
 0x187   : > { %543 = vst [vmem:[%s1821_s15 + $0x310] sm:$0xff] %v2791_v43  ;;  %v2846_v43 = vld [vmem:[#allocation100_spill] sm:$0xff] }
 0x188   : > { %544 = vst [vmem:[%s1821_s15 + $0x318] sm:$0xff] %v2792_v44  ;;  %v2847_v44 = vld [vmem:[#allocation101_spill] sm:$0xff] }
 0x189   : > { %545 = vst [vmem:[%s1821_s15 + $0x320] sm:$0xff] %v2793_v45  ;;  %v2848_v45 = vld [vmem:[#allocation102_spill] sm:$0xff] }
 0x18a   : > { %546 = vst [vmem:[%s1821_s15 + $0x328] sm:$0xff] %v2794_v46  ;;  %v2849_v46 = vld [vmem:[#allocation103_spill] sm:$0xff] }
 0x18b   : > { %547 = vst [vmem:[%s1821_s15 + $0x330] sm:$0xff] %v2795_v47  ;;  %v2850_v47 = vld [vmem:[#allocation104_spill] sm:$0xff] }
 0x18c   : > { %548 = vst [vmem:[%s1821_s15 + $0x338] sm:$0xff] %v2796_v48  ;;  %v2851_v48 = vld [vmem:[#allocation105_spill] sm:$0xff] }
 0x18d   : > { %549 = vst [vmem:[%s1821_s15 + $0x340] sm:$0xff] %v2797_v49  ;;  %v2852_v49 = vld [vmem:[#allocation106_spill] sm:$0xff] }
 0x18e   : > { %550 = vst [vmem:[%s1821_s15 + $0x348] sm:$0xff] %v2798_v50  ;;  %v2853_v50 = vld [vmem:[#allocation107_spill] sm:$0xff] }
 0x18f   : > { %551 = vst [vmem:[%s1821_s15 + $0x350] sm:$0xff] %v2799_v51  ;;  %v2854_v51 = vld [vmem:[#allocation108_spill] sm:$0xff] }
 0x190   : > { %552 = vst [vmem:[%s1821_s15 + $0x358] sm:$0xff] %v2800_v52  ;;  %v2855_v52 = vld [vmem:[#allocation109_spill] sm:$0xff] }
 0x191   : > { %553 = vst [vmem:[%s1821_s15 + $0x360] sm:$0xff] %v2801_v53  ;;  %v2856_v53 = vld [vmem:[#allocation110_spill] sm:$0xff] }
 0x192   : > { %554 = vst [vmem:[%s1821_s15 + $0x368] sm:$0xff] %v2802_v54  ;;  %v2857_v54 = vld [vmem:[#allocation111_spill] sm:$0xff] }
 0x193   : > { %555 = vst [vmem:[%s1821_s15 + $0x370] sm:$0xff] %v2803_v0  ;;  %v2858_v0 = vld [vmem:[#allocation112_spill] sm:$0xff] }
 0x194   : > { %556 = vst [vmem:[%s1821_s15 + $0x378] sm:$0xff] %v2804_v1  ;;  %v2859_v1 = vld [vmem:[#allocation113_spill] sm:$0xff] }
 0x195   : > { %557 = vst [vmem:[%s1821_s15 + $0x380] sm:$0xff] %v2805_v2  ;;  %v2860_v2 = vld [vmem:[#allocation114_spill] sm:$0xff] }
 0x196   : > { %558 = vst [vmem:[%s1821_s15 + $0x388] sm:$0xff] %v2806_v3  ;;  %v2861_v3 = vld [vmem:[#allocation115_spill] sm:$0xff] }
 0x197   : > { %559 = vst [vmem:[%s1821_s15 + $0x390] sm:$0xff] %v2807_v4  ;;  %v2862_v4 = vld [vmem:[#allocation116_spill] sm:$0xff] }
 0x198   : > { %560 = vst [vmem:[%s1821_s15 + $0x398] sm:$0xff] %v2808_v5  ;;  %v2863_v5 = vld [vmem:[#allocation117_spill] sm:$0xff] }
 0x199   : > { %561 = vst [vmem:[%s1821_s15 + $0x3a0] sm:$0xff] %v2809_v6  ;;  %v2864_v6 = vld [vmem:[#allocation118_spill] sm:$0xff] }
 0x19a   : > { %562 = vst [vmem:[%s1821_s15 + $0x3a8] sm:$0xff] %v2810_v7  ;;  %v2865_v7 = vld [vmem:[#allocation119_spill] sm:$0xff] }
 0x19b   : > { %563 = vst [vmem:[%s1821_s15 + $0x3b0] sm:$0xff] %v2811_v8  ;;  %v2866_v8 = vld [vmem:[#allocation120_spill] sm:$0xff] }
 0x19c   : > { %564 = vst [vmem:[%s1821_s15 + $0x3b8] sm:$0xff] %v2812_v9  ;;  %v2867_v9 = vld [vmem:[#allocation121_spill] sm:$0xff] }
 0x19d   : > { %565 = vst [vmem:[%s1821_s15 + $0x3c0] sm:$0xff] %v2813_v10  ;;  %v2868_v10 = vld [vmem:[#allocation122_spill] sm:$0xff] }
 0x19e   : > { %566 = vst [vmem:[%s1821_s15 + $0x3c8] sm:$0xff] %v2814_v11  ;;  %v2869_v11 = vld [vmem:[#allocation123_spill] sm:$0xff] }
 0x19f   : > { %567 = vst [vmem:[%s1821_s15 + $0x3d0] sm:$0xff] %v2815_v12  ;;  %v2870_v12 = vld [vmem:[#allocation124_spill] sm:$0xff] }
 0x1a0   : > { %568 = vst [vmem:[%s1821_s15 + $0x3d8] sm:$0xff] %v2816_v13  ;;  %v2871_v13 = vld [vmem:[#allocation125_spill] sm:$0xff] }
 0x1a1   : > { %569 = vst [vmem:[%s1821_s15 + $0x3e0] sm:$0xff] %v2817_v14  ;;  %v2872_v14 = vld [vmem:[#allocation126_spill] sm:$0xff] }
 0x1a2   : > { %570 = vst [vmem:[%s1821_s15 + $0x3e8] sm:$0xff] %v2818_v15  ;;  %v2873_v15 = vld [vmem:[#allocation127_spill] sm:$0xff] }
 0x1a3   : > { %571 = vst [vmem:[%s1821_s15 + $0x3f0] sm:$0xff] %v2819_v16  ;;  %v2874_v16 = vld [vmem:[#allocation128_spill] sm:$0xff] }
 0x1a4   : > { %572 = vst [vmem:[%s1821_s15 + $0x3f8] sm:$0xff] %v2820_v17  ;;  %v2875_v17 = vld [vmem:[#allocation129_spill] sm:$0xff] }
 0x1a5   : > { %573 = vst [vmem:[%s1821_s15 + $0x400] sm:$0xff] %v2821_v18  ;;  %v2876_v18 = vld [vmem:[#allocation130_spill] sm:$0xff] }
 0x1a6   : > { %574 = vst [vmem:[%s1821_s15 + $0x408] sm:$0xff] %v2822_v19  ;;  %v2877_v19 = vld [vmem:[#allocation131_spill] sm:$0xff] }
 0x1a7   : > { %575 = vst [vmem:[%s1821_s15 + $0x410] sm:$0xff] %v2823_v20  ;;  %v2878_v20 = vld [vmem:[#allocation132_spill] sm:$0xff] }
 0x1a8   : > { %576 = vst [vmem:[%s1821_s15 + $0x418] sm:$0xff] %v2824_v21  ;;  %v2879_v21 = vld [vmem:[#allocation133_spill] sm:$0xff] }
 0x1a9   : > { %577 = vst [vmem:[%s1821_s15 + $0x420] sm:$0xff] %v2825_v22  ;;  %v2880_v22 = vld [vmem:[#allocation134_spill] sm:$0xff] }
 0x1aa   : > { %578 = vst [vmem:[%s1821_s15 + $0x428] sm:$0xff] %v2826_v23  ;;  %v2881_v23 = vld [vmem:[#allocation135_spill] sm:$0xff] }
 0x1ab   : > { %579 = vst [vmem:[%s1821_s15 + $0x430] sm:$0xff] %v2827_v24  ;;  %v2882_v24 = vld [vmem:[#allocation136_spill] sm:$0xff] }
 0x1ac   : > { %580 = vst [vmem:[%s1821_s15 + $0x438] sm:$0xff] %v2828_v25  ;;  %v2883_v25 = vld [vmem:[#allocation137_spill] sm:$0xff] }
 0x1ad   : > { %581 = vst [vmem:[%s1821_s15 + $0x440] sm:$0xff] %v2829_v26  ;;  %v2884_v26 = vld [vmem:[#allocation138_spill] sm:$0xff] }
 0x1ae   : > { %582 = vst [vmem:[%s1821_s15 + $0x448] sm:$0xff] %v2830_v27  ;;  %v2885_v27 = vld [vmem:[#allocation139_spill] sm:$0xff] }
 0x1af   : > { %583 = vst [vmem:[%s1821_s15 + $0x450] sm:$0xff] %v2831_v28  ;;  %v2886_v28 = vld [vmem:[#allocation140_spill] sm:$0xff] }
 0x1b0   : > { %584 = vst [vmem:[%s1821_s15 + $0x458] sm:$0xff] %v2832_v29  ;;  %v2887_v29 = vld [vmem:[#allocation141_spill] sm:$0xff] }
 0x1b1   : > { %585 = vst [vmem:[%s1821_s15 + $0x460] sm:$0xff] %v2833_v30  ;;  %v2888_v30 = vld [vmem:[#allocation142_spill] sm:$0xff] }
 0x1b2   : > { %586 = vst [vmem:[%s1821_s15 + $0x468] sm:$0xff] %v2834_v31  ;;  %v2889_v31 = vld [vmem:[#allocation143_spill] sm:$0xff] }
 0x1b3   : > { %587 = vst [vmem:[%s1821_s15 + $0x470] sm:$0xff] %v2835_v32  ;;  %v2890_v32 = vld [vmem:[#allocation144_spill] sm:$0xff] }
 0x1b4   : > { %588 = vst [vmem:[%s1821_s15 + $0x478] sm:$0xff] %v2836_v33  ;;  %v2891_v33 = vld [vmem:[#allocation145_spill] sm:$0xff] }
 0x1b5   : > { %589 = vst [vmem:[%s1821_s15 + $0x480] sm:$0xff] %v2837_v34  ;;  %v2892_v34 = vld [vmem:[#allocation146_spill] sm:$0xff] }
 0x1b6   : > { %590 = vst [vmem:[%s1821_s15 + $0x488] sm:$0xff] %v2838_v35  ;;  %v2893_v35 = vld [vmem:[#allocation147_spill] sm:$0xff] }
 0x1b7   : > { %591 = vst [vmem:[%s1821_s15 + $0x490] sm:$0xff] %v2839_v36  ;;  %v2894_v36 = vld [vmem:[#allocation148_spill] sm:$0xff] }
 0x1b8   : > { %592 = vst [vmem:[%s1821_s15 + $0x498] sm:$0xff] %v2840_v37  ;;  %v2895_v37 = vld [vmem:[#allocation149_spill] sm:$0xff] }
 0x1b9   : > { %593 = vst [vmem:[%s1821_s15 + $0x4a0] sm:$0xff] %v2841_v38  ;;  %v2896_v38 = vld [vmem:[#allocation150_spill] sm:$0xff] }
 0x1ba   : > { %594 = vst [vmem:[%s1821_s15 + $0x4a8] sm:$0xff] %v2842_v39  ;;  %v2897_v39 = vld [vmem:[#allocation151_spill] sm:$0xff] }
 0x1bb   : > { %595 = vst [vmem:[%s1821_s15 + $0x4b0] sm:$0xff] %v2843_v40  ;;  %v2898_v40 = vld [vmem:[#allocation152_spill] sm:$0xff] }
 0x1bc   : > { %596 = vst [vmem:[%s1821_s15 + $0x4b8] sm:$0xff] %v2844_v41  ;;  %v2899_v41 = vld [vmem:[#allocation153_spill] sm:$0xff] }
 0x1bd   : > { %597 = vst [vmem:[%s1821_s15 + $0x4c0] sm:$0xff] %v2845_v42  ;;  %v2900_v42 = vld [vmem:[#allocation154_spill] sm:$0xff] }
 0x1be   : > { %598 = vst [vmem:[%s1821_s15 + $0x4c8] sm:$0xff] %v2846_v43  ;;  %v2901_v43 = vld [vmem:[#allocation155_spill] sm:$0xff] }
 0x1bf   : > { %599 = vst [vmem:[%s1821_s15 + $0x4d0] sm:$0xff] %v2847_v44  ;;  %v2902_v44 = vld [vmem:[#allocation156_spill] sm:$0xff] }
 0x1c0   : > { %600 = vst [vmem:[%s1821_s15 + $0x4d8] sm:$0xff] %v2848_v45  ;;  %v2903_v45 = vld [vmem:[#allocation157_spill] sm:$0xff] }
 0x1c1   : > { %601 = vst [vmem:[%s1821_s15 + $0x4e0] sm:$0xff] %v2849_v46  ;;  %v2904_v46 = vld [vmem:[#allocation158_spill] sm:$0xff] }
 0x1c2   : > { %602 = vst [vmem:[%s1821_s15 + $0x4e8] sm:$0xff] %v2850_v47  ;;  %v2905_v47 = vld [vmem:[#allocation159_spill] sm:$0xff] }
 0x1c3   : > { %603 = vst [vmem:[%s1821_s15 + $0x4f0] sm:$0xff] %v2851_v48  ;;  %v2906_v48 = vld [vmem:[#allocation160_spill] sm:$0xff] }
 0x1c4   : > { %604 = vst [vmem:[%s1821_s15 + $0x4f8] sm:$0xff] %v2852_v49  ;;  %v2907_v49 = vld [vmem:[#allocation161_spill] sm:$0xff] }
 0x1c5   : > { %605 = vst [vmem:[%s1821_s15 + $0x500] sm:$0xff] %v2853_v50  ;;  %v2908_v50 = vld [vmem:[#allocation162_spill] sm:$0xff] }
 0x1c6   : > { %606 = vst [vmem:[%s1821_s15 + $0x508] sm:$0xff] %v2854_v51  ;;  %v2909_v51 = vld [vmem:[#allocation163_spill] sm:$0xff] }
 0x1c7   : > { %607 = vst [vmem:[%s1821_s15 + $0x510] sm:$0xff] %v2855_v52  ;;  %v2910_v52 = vld [vmem:[#allocation164_spill] sm:$0xff] }
 0x1c8   : > { %608 = vst [vmem:[%s1821_s15 + $0x518] sm:$0xff] %v2856_v53  ;;  %v2911_v53 = vld [vmem:[#allocation165_spill] sm:$0xff] }
 0x1c9   : > { %609 = vst [vmem:[%s1821_s15 + $0x520] sm:$0xff] %v2857_v54  ;;  %v2912_v54 = vld [vmem:[#allocation166_spill] sm:$0xff] }
 0x1ca   : > { %610 = vst [vmem:[%s1821_s15 + $0x528] sm:$0xff] %v2858_v0  ;;  %v2913_v0 = vld [vmem:[#allocation167_spill] sm:$0xff] }
 0x1cb   : > { %611 = vst [vmem:[%s1821_s15 + $0x530] sm:$0xff] %v2859_v1  ;;  %v2914_v1 = vld [vmem:[#allocation168_spill] sm:$0xff] }
 0x1cc   : > { %612 = vst [vmem:[%s1821_s15 + $0x538] sm:$0xff] %v2860_v2  ;;  %v2915_v2 = vld [vmem:[#allocation169_spill] sm:$0xff] }
 0x1cd   : > { %613 = vst [vmem:[%s1821_s15 + $0x540] sm:$0xff] %v2861_v3  ;;  %v2916_v3 = vld [vmem:[#allocation170_spill] sm:$0xff] }
 0x1ce   : > { %614 = vst [vmem:[%s1821_s15 + $0x548] sm:$0xff] %v2862_v4  ;;  %v2917_v4 = vld [vmem:[#allocation171_spill] sm:$0xff] }
 0x1cf   : > { %615 = vst [vmem:[%s1821_s15 + $0x550] sm:$0xff] %v2863_v5  ;;  %v2918_v5 = vld [vmem:[#allocation172_spill] sm:$0xff] }
 0x1d0   : > { %616 = vst [vmem:[%s1821_s15 + $0x558] sm:$0xff] %v2864_v6  ;;  %v2919_v6 = vld [vmem:[#allocation173_spill] sm:$0xff] }
 0x1d1   : > { %617 = vst [vmem:[%s1821_s15 + $0x560] sm:$0xff] %v2865_v7  ;;  %v2920_v7 = vld [vmem:[#allocation174_spill] sm:$0xff] }
 0x1d2   : > { %618 = vst [vmem:[%s1821_s15 + $0x568] sm:$0xff] %v2866_v8  ;;  %v2921_v8 = vld [vmem:[#allocation175_spill] sm:$0xff] }
 0x1d3   : > { %619 = vst [vmem:[%s1821_s15 + $0x570] sm:$0xff] %v2867_v9  ;;  %v2922_v9 = vld [vmem:[#allocation176_spill] sm:$0xff] }
 0x1d4   : > { %620 = vst [vmem:[%s1821_s15 + $0x578] sm:$0xff] %v2868_v10  ;;  %v2923_v10 = vld [vmem:[#allocation177_spill] sm:$0xff] }
 0x1d5   : > { %621 = vst [vmem:[%s1821_s15 + $0x580] sm:$0xff] %v2869_v11  ;;  %v2924_v11 = vld [vmem:[#allocation178_spill] sm:$0xff] }
 0x1d6   : > { %622 = vst [vmem:[%s1821_s15 + $0x588] sm:$0xff] %v2870_v12  ;;  %v2925_v12 = vld [vmem:[#allocation179_spill] sm:$0xff] }
 0x1d7   : > { %623 = vst [vmem:[%s1821_s15 + $0x590] sm:$0xff] %v2871_v13  ;;  %v2926_v13 = vld [vmem:[#allocation180_spill] sm:$0xff] }
 0x1d8   : > { %624 = vst [vmem:[%s1821_s15 + $0x598] sm:$0xff] %v2872_v14  ;;  %v2927_v14 = vld [vmem:[#allocation181_spill] sm:$0xff] }
 0x1d9   : > { %625 = vst [vmem:[%s1821_s15 + $0x5a0] sm:$0xff] %v2873_v15  ;;  %v2928_v15 = vld [vmem:[#allocation182_spill] sm:$0xff] }
 0x1da   : > { %626 = vst [vmem:[%s1821_s15 + $0x5a8] sm:$0xff] %v2874_v16  ;;  %v2929_v16 = vld [vmem:[#allocation183_spill] sm:$0xff] }
 0x1db   : > { %627 = vst [vmem:[%s1821_s15 + $0x5b0] sm:$0xff] %v2875_v17  ;;  %v2930_v17 = vld [vmem:[#allocation184_spill] sm:$0xff] }
 0x1dc   : > { %628 = vst [vmem:[%s1821_s15 + $0x5b8] sm:$0xff] %v2876_v18  ;;  %v2931_v18 = vld [vmem:[#allocation185_spill] sm:$0xff] }
 0x1dd   : > { %629 = vst [vmem:[%s1821_s15 + $0x5c0] sm:$0xff] %v2877_v19  ;;  %v2932_v19 = vld [vmem:[#allocation186_spill] sm:$0xff] }
 0x1de   : > { %630 = vst [vmem:[%s1821_s15 + $0x5c8] sm:$0xff] %v2878_v20  ;;  %v2933_v20 = vld [vmem:[#allocation187_spill] sm:$0xff] }
 0x1df   : > { %631 = vst [vmem:[%s1821_s15 + $0x5d0] sm:$0xff] %v2879_v21  ;;  %v2934_v21 = vld [vmem:[#allocation188_spill] sm:$0xff] }
 0x1e0   : > { %632 = vst [vmem:[%s1821_s15 + $0x5d8] sm:$0xff] %v2880_v22  ;;  %v2935_v22 = vld [vmem:[#allocation189_spill] sm:$0xff] }
 0x1e1   : > { %633 = vst [vmem:[%s1821_s15 + $0x5e0] sm:$0xff] %v2881_v23  ;;  %v2936_v23 = vld [vmem:[#allocation190_spill] sm:$0xff] }
 0x1e2   : > { %634 = vst [vmem:[%s1821_s15 + $0x5e8] sm:$0xff] %v2882_v24  ;;  %v2937_v24 = vld [vmem:[#allocation191_spill] sm:$0xff] }
 0x1e3   : > { %635 = vst [vmem:[%s1821_s15 + $0x5f0] sm:$0xff] %v2883_v25  ;;  %v2938_v25 = vld [vmem:[#allocation192_spill] sm:$0xff] }
 0x1e4   : > { %636 = vst [vmem:[%s1821_s15 + $0x5f8] sm:$0xff] %v2884_v26  ;;  %v2939_v26 = vld [vmem:[#allocation193_spill] sm:$0xff] }
 0x1e5   : > { %637 = vst [vmem:[%s1821_s15 + $0x600] sm:$0xff] %v2885_v27  ;;  %v2940_v27 = vld [vmem:[#allocation194_spill] sm:$0xff] }
 0x1e6   : > { %638 = vst [vmem:[%s1821_s15 + $0x608] sm:$0xff] %v2886_v28  ;;  %v2941_v28 = vld [vmem:[#allocation195_spill] sm:$0xff] }
 0x1e7   : > { %639 = vst [vmem:[%s1821_s15 + $0x610] sm:$0xff] %v2887_v29  ;;  %v2942_v29 = vld [vmem:[#allocation196_spill] sm:$0xff] }
 0x1e8   : > { %640 = vst [vmem:[%s1821_s15 + $0x618] sm:$0xff] %v2888_v30  ;;  %v2943_v30 = vld [vmem:[#allocation197_spill] sm:$0xff] }
 0x1e9   : > { %641 = vst [vmem:[%s1821_s15 + $0x620] sm:$0xff] %v2889_v31  ;;  %v2944_v31 = vld [vmem:[#allocation198_spill] sm:$0xff] }
 0x1ea   : > { %642 = vst [vmem:[%s1821_s15 + $0x628] sm:$0xff] %v2890_v32  ;;  %v2945_v32 = vld [vmem:[#allocation199_spill] sm:$0xff] }
 0x1eb   : > { %643 = vst [vmem:[%s1821_s15 + $0x630] sm:$0xff] %v2891_v33  ;;  %v2946_v33 = vld [vmem:[#allocation200_spill] sm:$0xff] }
 0x1ec   : > { %644 = vst [vmem:[%s1821_s15 + $0x638] sm:$0xff] %v2892_v34  ;;  %v2947_v34 = vld [vmem:[#allocation201_spill] sm:$0xff] }
 0x1ed   : > { %645 = vst [vmem:[%s1821_s15 + $0x640] sm:$0xff] %v2893_v35  ;;  %v2948_v35 = vld [vmem:[#allocation202_spill] sm:$0xff] }
 0x1ee   : > { %646 = vst [vmem:[%s1821_s15 + $0x648] sm:$0xff] %v2894_v36  ;;  %v2949_v36 = vld [vmem:[#allocation203_spill] sm:$0xff] }
 0x1ef   : > { %647 = vst [vmem:[%s1821_s15 + $0x650] sm:$0xff] %v2895_v37  ;;  %v2950_v37 = vld [vmem:[#allocation204_spill] sm:$0xff] }
 0x1f0   : > { %648 = vst [vmem:[%s1821_s15 + $0x658] sm:$0xff] %v2896_v38  ;;  %v2951_v38 = vld [vmem:[#allocation205_spill] sm:$0xff] }
 0x1f1   : > { %649 = vst [vmem:[%s1821_s15 + $0x660] sm:$0xff] %v2897_v39  ;;  %v2952_v39 = vld [vmem:[#allocation206_spill] sm:$0xff] }
 0x1f2   : > { %650 = vst [vmem:[%s1821_s15 + $0x668] sm:$0xff] %v2898_v40  ;;  %v2953_v40 = vld [vmem:[#allocation207_spill] sm:$0xff] }
 0x1f3   : > { %651 = vst [vmem:[%s1821_s15 + $0x670] sm:$0xff] %v2899_v41  ;;  %v2954_v41 = vld [vmem:[#allocation208_spill] sm:$0xff] }
 0x1f4   : > { %652 = vst [vmem:[%s1821_s15 + $0x678] sm:$0xff] %v2900_v42  ;;  %v2955_v42 = vld [vmem:[#allocation209_spill] sm:$0xff] }
 0x1f5   : > { %653 = vst [vmem:[%s1821_s15 + $0x680] sm:$0xff] %v2901_v43  ;;  %v2956_v43 = vld [vmem:[#allocation210_spill] sm:$0xff] }
 0x1f6   : > { %654 = vst [vmem:[%s1821_s15 + $0x688] sm:$0xff] %v2902_v44  ;;  %v2957_v44 = vld [vmem:[#allocation211_spill] sm:$0xff] }
 0x1f7   : > { %655 = vst [vmem:[%s1821_s15 + $0x690] sm:$0xff] %v2903_v45  ;;  %v2958_v45 = vld [vmem:[#allocation212_spill] sm:$0xff] }
 0x1f8   : > { %656 = vst [vmem:[%s1821_s15 + $0x698] sm:$0xff] %v2904_v46  ;;  %v2959_v46 = vld [vmem:[#allocation213_spill] sm:$0xff] }
 0x1f9   : > { %657 = vst [vmem:[%s1821_s15 + $0x6a0] sm:$0xff] %v2905_v47  ;;  %v2960_v47 = vld [vmem:[#allocation214_spill] sm:$0xff] }
 0x1fa   : > { %658 = vst [vmem:[%s1821_s15 + $0x6a8] sm:$0xff] %v2906_v48  ;;  %v2961_v48 = vld [vmem:[#allocation215_spill] sm:$0xff] }
 0x1fb   : > { %659 = vst [vmem:[%s1821_s15 + $0x6b0] sm:$0xff] %v2907_v49  ;;  %v2962_v49 = vld [vmem:[#allocation216_spill] sm:$0xff] }
 0x1fc   : > { %660 = vst [vmem:[%s1821_s15 + $0x6b8] sm:$0xff] %v2908_v50  ;;  %v2963_v50 = vld [vmem:[#allocation217_spill] sm:$0xff] }
 0x1fd   : > { %661 = vst [vmem:[%s1821_s15 + $0x6c0] sm:$0xff] %v2909_v51  ;;  %v2964_v51 = vld [vmem:[#allocation218_spill] sm:$0xff] }
 0x1fe   : > { %662 = vst [vmem:[%s1821_s15 + $0x6c8] sm:$0xff] %v2910_v52  ;;  %v2965_v52 = vld [vmem:[#allocation219_spill] sm:$0xff] }
 0x1ff   : > { %663 = vst [vmem:[%s1821_s15 + $0x6d0] sm:$0xff] %v2911_v53  ;;  %v2966_v53 = vld [vmem:[#allocation220_spill] sm:$0xff] }
 0x200   : > { %664 = vst [vmem:[%s1821_s15 + $0x6d8] sm:$0xff] %v2912_v54  ;;  %v2967_v54 = vld [vmem:[#allocation221_spill] sm:$0xff] }
 0x201   : > { %665 = vst [vmem:[%s1821_s15 + $0x6e0] sm:$0xff] %v2913_v0  ;;  %v2968_v0 = vld [vmem:[#allocation222_spill] sm:$0xff] }
 0x202   : > { %666 = vst [vmem:[%s1821_s15 + $0x6e8] sm:$0xff] %v2914_v1  ;;  %v2969_v1 = vld [vmem:[#allocation223_spill] sm:$0xff] }
 0x203   : > { %667 = vst [vmem:[%s1821_s15 + $0x6f0] sm:$0xff] %v2915_v2  ;;  %v2970_v2 = vld [vmem:[#allocation224_spill] sm:$0xff] }
 0x204   : > { %668 = vst [vmem:[%s1821_s15 + $0x6f8] sm:$0xff] %v2916_v3  ;;  %v2971_v3 = vld [vmem:[#allocation225_spill] sm:$0xff] }
 0x205   : > { %669 = vst [vmem:[%s1821_s15 + $0x700] sm:$0xff] %v2917_v4  ;;  %v2972_v4 = vld [vmem:[#allocation226_spill] sm:$0xff] }
 0x206   : > { %670 = vst [vmem:[%s1821_s15 + $0x708] sm:$0xff] %v2918_v5  ;;  %v2973_v5 = vld [vmem:[#allocation227_spill] sm:$0xff] }
 0x207   : > { %671 = vst [vmem:[%s1821_s15 + $0x710] sm:$0xff] %v2919_v6  ;;  %v2974_v6 = vld [vmem:[#allocation228_spill] sm:$0xff] }
 0x208   : > { %672 = vst [vmem:[%s1821_s15 + $0x718] sm:$0xff] %v2920_v7  ;;  %v2975_v7 = vld [vmem:[#allocation229_spill] sm:$0xff] }
 0x209   : > { %673 = vst [vmem:[%s1821_s15 + $0x720] sm:$0xff] %v2921_v8  ;;  %v2976_v8 = vld [vmem:[#allocation230_spill] sm:$0xff] }
 0x20a   : > { %674 = vst [vmem:[%s1821_s15 + $0x728] sm:$0xff] %v2922_v9  ;;  %v2977_v9 = vld [vmem:[#allocation231_spill] sm:$0xff] }
 0x20b   : > { %675 = vst [vmem:[%s1821_s15 + $0x730] sm:$0xff] %v2923_v10  ;;  %v2978_v10 = vld [vmem:[#allocation232_spill] sm:$0xff] }
 0x20c   : > { %676 = vst [vmem:[%s1821_s15 + $0x738] sm:$0xff] %v2924_v11  ;;  %v2979_v11 = vld [vmem:[#allocation233_spill] sm:$0xff] }
 0x20d   : > { %677 = vst [vmem:[%s1821_s15 + $0x740] sm:$0xff] %v2925_v12  ;;  %v2980_v12 = vld [vmem:[#allocation234_spill] sm:$0xff] }
 0x20e   : > { %678 = vst [vmem:[%s1821_s15 + $0x748] sm:$0xff] %v2926_v13  ;;  %v2981_v13 = vld [vmem:[#allocation235_spill] sm:$0xff] }
 0x20f   : > { %679 = vst [vmem:[%s1821_s15 + $0x750] sm:$0xff] %v2927_v14  ;;  %v2982_v14 = vld [vmem:[#allocation236_spill] sm:$0xff] }
 0x210   : > { %680 = vst [vmem:[%s1821_s15 + $0x758] sm:$0xff] %v2928_v15  ;;  %v2983_v15 = vld [vmem:[#allocation237_spill] sm:$0xff] }
 0x211   : > { %681 = vst [vmem:[%s1821_s15 + $0x760] sm:$0xff] %v2929_v16  ;;  %v2984_v16 = vld [vmem:[#allocation238_spill] sm:$0xff] }
 0x212   : > { %682 = vst [vmem:[%s1821_s15 + $0x768] sm:$0xff] %v2930_v17  ;;  %v2985_v17 = vld [vmem:[#allocation239_spill] sm:$0xff] }
 0x213   : > { %683 = vst [vmem:[%s1821_s15 + $0x770] sm:$0xff] %v2931_v18  ;;  %v2986_v18 = vld [vmem:[#allocation240_spill] sm:$0xff] }
 0x214   : > { %684 = vst [vmem:[%s1821_s15 + $0x778] sm:$0xff] %v2932_v19  ;;  %v2987_v19 = vld [vmem:[#allocation241_spill] sm:$0xff] }
 0x215   : > { %685 = vst [vmem:[%s1821_s15 + $0x780] sm:$0xff] %v2933_v20  ;;  %v2988_v20 = vld [vmem:[#allocation242_spill] sm:$0xff] }
 0x216   : > { %686 = vst [vmem:[%s1821_s15 + $0x788] sm:$0xff] %v2934_v21  ;;  %v2989_v21 = vld [vmem:[#allocation243_spill] sm:$0xff] }
 0x217   : > { %687 = vst [vmem:[%s1821_s15 + $0x790] sm:$0xff] %v2935_v22  ;;  %v2990_v22 = vld [vmem:[#allocation244_spill] sm:$0xff] }
 0x218   : > { %688 = vst [vmem:[%s1821_s15 + $0x798] sm:$0xff] %v2936_v23  ;;  %v2991_v23 = vld [vmem:[#allocation245_spill] sm:$0xff] }
 0x219   : > { %689 = vst [vmem:[%s1821_s15 + $0x7a0] sm:$0xff] %v2937_v24  ;;  %v2992_v24 = vld [vmem:[#allocation246_spill] sm:$0xff] }
 0x21a   : > { %690 = vst [vmem:[%s1821_s15 + $0x7a8] sm:$0xff] %v2938_v25  ;;  %v2993_v25 = vld [vmem:[#allocation247_spill] sm:$0xff] }
 0x21b   : > { %691 = vst [vmem:[%s1821_s15 + $0x7b0] sm:$0xff] %v2939_v26  ;;  %v2994_v26 = vld [vmem:[#allocation248_spill] sm:$0xff] }
 0x21c   : > { %692 = vst [vmem:[%s1821_s15 + $0x7b8] sm:$0xff] %v2940_v27  ;;  %v2995_v27 = vld [vmem:[#allocation249_spill] sm:$0xff] }
 0x21d   : > { %693 = vst [vmem:[%s1821_s15 + $0x7c0] sm:$0xff] %v2941_v28  ;;  %v2996_v28 = vld [vmem:[#allocation250_spill] sm:$0xff] }
 0x21e   : > { %694 = vst [vmem:[%s1821_s15 + $0x7c8] sm:$0xff] %v2942_v29  ;;  %v2997_v29 = vld [vmem:[#allocation251_spill] sm:$0xff] }
 0x21f   : > { %695 = vst [vmem:[%s1821_s15 + $0x7d0] sm:$0xff] %v2943_v30  ;;  %v2998_v30 = vld [vmem:[#allocation252_spill] sm:$0xff] }
 0x220   : > { %696 = vst [vmem:[%s1821_s15 + $0x7d8] sm:$0xff] %v2944_v31  ;;  %v2999_v31 = vld [vmem:[#allocation253_spill] sm:$0xff] }
 0x221   : > { %697 = vst [vmem:[%s1821_s15 + $0x7e0] sm:$0xff] %v2945_v32  ;;  %v3000_v32 = vld [vmem:[#allocation254_spill] sm:$0xff] }
 0x222   : > { %698 = vst [vmem:[%s1821_s15 + $0x7e8] sm:$0xff] %v2946_v33  ;;  %v3001_v33 = vld [vmem:[#allocation255_spill] sm:$0xff] }
 0x223   : > { %699 = vst [vmem:[%s1821_s15 + $0x7f0] sm:$0xff] %v2947_v34  ;;  %v3002_v34 = vld [vmem:[#allocation256_spill] sm:$0xff] }
 0x224   : > { %700 = vst [vmem:[%s1821_s15 + $0x7f8] sm:$0xff] %v2948_v35  ;;  %v3003_v35 = vld [vmem:[#allocation257_spill] sm:$0xff] }
 0x225   : > { %701 = vst [vmem:[%s1821_s15 + $0x800] sm:$0xff] %v2949_v36 }
 0x226   : > { %702 = vst [vmem:[%s1821_s15 + $0x808] sm:$0xff] %v2950_v37 }
 0x227   : > { %703 = vst [vmem:[%s1821_s15 + $0x810] sm:$0xff] %v2951_v38 }
 0x228   : > { %704 = vst [vmem:[%s1821_s15 + $0x818] sm:$0xff] %v2952_v39 }
 0x229   : > { %705 = vst [vmem:[%s1821_s15 + $0x820] sm:$0xff] %v2953_v40 }
 0x22a   : > { %706 = vst [vmem:[%s1821_s15 + $0x828] sm:$0xff] %v2954_v41 }
 0x22b   : > { %707 = vst [vmem:[%s1821_s15 + $0x830] sm:$0xff] %v2955_v42 }
 0x22c   : > { %708 = vst [vmem:[%s1821_s15 + $0x838] sm:$0xff] %v2956_v43 }
 0x22d   : > { %709 = vst [vmem:[%s1821_s15 + $0x840] sm:$0xff] %v2957_v44 }
 0x22e   : > { %710 = vst [vmem:[%s1821_s15 + $0x848] sm:$0xff] %v2958_v45 }
 0x22f   : > { %711 = vst [vmem:[%s1821_s15 + $0x850] sm:$0xff] %v2959_v46 }
 0x230   : > { %712 = vst [vmem:[%s1821_s15 + $0x858] sm:$0xff] %v2960_v47 }
 0x231   : > { %713 = vst [vmem:[%s1821_s15 + $0x860] sm:$0xff] %v2961_v48 }
 0x232   : > { %714 = vst [vmem:[%s1821_s15 + $0x868] sm:$0xff] %v2962_v49 }
 0x233   : > { %715 = vst [vmem:[%s1821_s15 + $0x870] sm:$0xff] %v2963_v50 }
 0x234   : > { %716 = vst [vmem:[%s1821_s15 + $0x878] sm:$0xff] %v2964_v51 }
 0x235   : > { %717 = vst [vmem:[%s1821_s15 + $0x880] sm:$0xff] %v2965_v52 }
 0x236   : > { %718 = vst [vmem:[%s1821_s15 + $0x888] sm:$0xff] %v2966_v53 }
 0x237   : > { %719 = vst [vmem:[%s1821_s15 + $0x890] sm:$0xff] %v2967_v54 }
 0x238   : > { %720 = vst [vmem:[%s1821_s15 + $0x898] sm:$0xff] %v2968_v0 }
 0x239   : > { %721 = vst [vmem:[%s1821_s15 + $0x8a0] sm:$0xff] %v2969_v1 }
 0x23a   : > { %722 = vst [vmem:[%s1821_s15 + $0x8a8] sm:$0xff] %v2970_v2 }
 0x23b   : > { %723 = vst [vmem:[%s1821_s15 + $0x8b0] sm:$0xff] %v2971_v3 }
 0x23c   : > { %724 = vst [vmem:[%s1821_s15 + $0x8b8] sm:$0xff] %v2972_v4 }
 0x23d   : > { %725 = vst [vmem:[%s1821_s15 + $0x8c0] sm:$0xff] %v2973_v5 }
 0x23e   : > { %726 = vst [vmem:[%s1821_s15 + $0x8c8] sm:$0xff] %v2974_v6 }
 0x23f   : > { %727 = vst [vmem:[%s1821_s15 + $0x8d0] sm:$0xff] %v2975_v7 }
 0x240   : > { %728 = vst [vmem:[%s1821_s15 + $0x8d8] sm:$0xff] %v2976_v8 }
 0x241   : > { %729 = vst [vmem:[%s1821_s15 + $0x8e0] sm:$0xff] %v2977_v9 }
 0x242   : > { %730 = vst [vmem:[%s1821_s15 + $0x8e8] sm:$0xff] %v2978_v10 }
 0x243   : > { %731 = vst [vmem:[%s1821_s15 + $0x8f0] sm:$0xff] %v2979_v11 }
 0x244   : > { %732 = vst [vmem:[%s1821_s15 + $0x8f8] sm:$0xff] %v2980_v12 }
 0x245   : > { %733 = vst [vmem:[%s1821_s15 + $0x900] sm:$0xff] %v2981_v13 }
 0x246   : > { %734 = vst [vmem:[%s1821_s15 + $0x908] sm:$0xff] %v2982_v14 }
 0x247   : > { %735 = vst [vmem:[%s1821_s15 + $0x910] sm:$0xff] %v2983_v15 }
 0x248   : > { %736 = vst [vmem:[%s1821_s15 + $0x918] sm:$0xff] %v2984_v16 }
 0x249   : > { %737 = vst [vmem:[%s1821_s15 + $0x920] sm:$0xff] %v2985_v17 }
 0x24a   : > { %738 = vst [vmem:[%s1821_s15 + $0x928] sm:$0xff] %v2986_v18 }
 0x24b   : > { %739 = vst [vmem:[%s1821_s15 + $0x930] sm:$0xff] %v2987_v19 }
 0x24c   : > { %740 = vst [vmem:[%s1821_s15 + $0x938] sm:$0xff] %v2988_v20 }
 0x24d   : > { %741 = vst [vmem:[%s1821_s15 + $0x940] sm:$0xff] %v2989_v21 }
 0x24e   : > { %742 = vst [vmem:[%s1821_s15 + $0x948] sm:$0xff] %v2990_v22 }
 0x24f   : > { %743 = vst [vmem:[%s1821_s15 + $0x950] sm:$0xff] %v2991_v23 }
 0x250   : > { %744 = vst [vmem:[%s1821_s15 + $0x958] sm:$0xff] %v2992_v24 }
 0x251   : > { %745 = vst [vmem:[%s1821_s15 + $0x960] sm:$0xff] %v2993_v25 }
 0x252   : > { %746 = vst [vmem:[%s1821_s15 + $0x968] sm:$0xff] %v2994_v26 }
 0x253   : > { %747 = vst [vmem:[%s1821_s15 + $0x970] sm:$0xff] %v2995_v27 }
 0x254   : > { %748 = vst [vmem:[%s1821_s15 + $0x978] sm:$0xff] %v1790_v58 }
 0x255   : > { %749 = vst [vmem:[%s1821_s15 + $0x980] sm:$0xff] %v1793_v59 }
 0x256   : > { %750 = vst [vmem:[%s1821_s15 + $0x988] sm:$0xff] %v2996_v28 }
 0x257   : > { %751 = vst [vmem:[%s1821_s15 + $0x990] sm:$0xff] %v2997_v29 }
 0x258   : > { %752 = vst [vmem:[%s1821_s15 + $0x998] sm:$0xff] %v2998_v30 }
 0x259   : > { %753 = vst [vmem:[%s1821_s15 + $0x9a0] sm:$0xff] %v2999_v31 }
 0x25a   : > { %754 = vst [vmem:[%s1821_s15 + $0x9a8] sm:$0xff] %v3000_v32 }
 0x25b   : > { %755 = vst [vmem:[%s1821_s15 + $0x9b0] sm:$0xff] %v3001_v33 }
 0x25c   : > { %756 = vst [vmem:[%s1821_s15 + $0x9b8] sm:$0xff] %v3002_v34 }
 0x25d   : > { %757 = vst [vmem:[%s1821_s15 + $0x9c0] sm:$0xff] %v3003_v35 }
 0x25e   : > { %758 = vst [vmem:[%s1821_s15 + $0x9c8] sm:$0xff] %v1827_v63 }
 0x25f   : > { %759 = vst [vmem:[%s1821_s15 + $0x9d0] sm:$0xff] %v1830_v57 }
 0x260   : > { %760 = vst [vmem:[%s1821_s15 + $0x9d8] sm:$0xff] %v1833_v55 }
 0x261   : > { %761 = vst [vmem:[%s1821_s15 + $0x9e0] sm:$0xff] %v1836_v61 }
 0x262   : > { %762 = vst [vmem:[%s1821_s15 + $0x9e8] sm:$0xff] %v1839_v56 }
 0x263   : > { %763 = vst [vmem:[%s1821_s15 + $0x9f0] sm:$0xff] %v1842_v60 }
 0x264   : > { %764 = vst [vmem:[%s1821_s15 + $0x9f8] sm:$0xff] %v1845_v62 }
 0x265 PF: > { %s11_s6 = sadd.s32 1, %s850_s6  }
 0x266   : > { %p8_p4 = scmp.ge.s32.totalorder %s11_s6, 4  }
 0x268   :  { %10 = sbr.rel (!%p8_p4) target bundleno = 1 (0x1), region = 54 }

</bundles_post_ra>
